<compile_context>
chip_gen: v5e
topology: v5e:2x2
jax: 0.10.0
libtpu: 0.0.40
codegen_flags: <defaults>
</compile_context>

<pallas_src>
import jax
import jax.numpy as jnp
from jax.experimental import pallas as pl
from jax.experimental.pallas import tpu as pltpu

L_IN = 512          # BACKBONE_DICT['PLIP']
D = 256
HEAD_PAD = 128      # fused-head output padded to a lane-dense 128 columns
N_TOKENS = 8        # small instance count for the demo

# packed f32 side-array layout: [b1(256) | bab(512) | wc(256) | br(256) | bh(128) | bc(1) pad]
OFF_B1 = 0
OFF_BAB = D                      # 256
OFF_WC = 3 * D                   # 768
OFF_BR = 4 * D                   # 1024
OFF_BH = 5 * D                   # 1280
OFF_BC = 5 * D + HEAD_PAD        # 1408
SIDE_W = 12 * 128                # 1536 (lane-dense)

CLASSIFICATION_DICT = {
    'CDH1_cls': 3, 'GATA3_cls': 3, 'PIK3CA_cls': 3, 'TP53_cls': 3, 'KRAS_cls': 3,
    'ARID1A_cls': 3, 'PTEN_cls': 3, 'BRAF_cls': 3, 'APC_cls': 3, 'ATRX_cls': 3,
    'IDH1_cls': 3,
}
REGRESSION_LIST = [
    'Cytotoxic_T_Lymphocyte', 'TIDE_CAF', 'TIDE_Dys', 'TIDE_M2', 'TIDE_MDSC',
    'HALLMARK_ADIPOGENESIS_sum', 'HALLMARK_ALLOGRAFT_REJECTION_sum',
    'HALLMARK_ANDROGEN_RESPONSE_sum', 'HALLMARK_ANGIOGENESIS_sum',
    'HALLMARK_APICAL_JUNCTION_sum', 'HALLMARK_APICAL_SURFACE_sum',
    'HALLMARK_APOPTOSIS_sum', 'HALLMARK_BILE_ACID_METABOLISM_sum',
    'HALLMARK_CHOLESTEROL_HOMEOSTASIS_sum', 'HALLMARK_COAGULATION_sum',
    'HALLMARK_COMPLEMENT_sum', 'HALLMARK_DNA_REPAIR_sum', 'HALLMARK_E2F_TARGETS_sum',
    'HALLMARK_EPITHELIAL_MESENCHYMAL_TRANSITION_sum',
    'HALLMARK_ESTROGEN_RESPONSE_EARLY_sum', 'HALLMARK_ESTROGEN_RESPONSE_LATE_sum',
    'HALLMARK_FATTY_ACID_METABOLISM_sum', 'HALLMARK_G2M_CHECKPOINT_sum',
    'HALLMARK_GLYCOLYSIS_sum', 'HALLMARK_HEDGEHOG_SIGNALING_sum',
    'HALLMARK_HEME_METABOLISM_sum', 'HALLMARK_HYPOXIA_sum',
    'HALLMARK_IL2_STAT5_SIGNALING_sum', 'HALLMARK_IL6_JAK_STAT3_SIGNALING_sum',
    'HALLMARK_INFLAMMATORY_RESPONSE_sum', 'HALLMARK_INTERFERON_ALPHA_RESPONSE_sum',
    'HALLMARK_INTERFERON_GAMMA_RESPONSE_sum', 'HALLMARK_KRAS_SIGNALING_DN_sum',
    'HALLMARK_KRAS_SIGNALING_UP_sum', 'HALLMARK_MITOTIC_SPINDLE_sum',
    'HALLMARK_MTORC1_SIGNALING_sum', 'HALLMARK_MYC_TARGETS_V1_sum',
    'HALLMARK_MYC_TARGETS_V2_sum', 'HALLMARK_MYOGENESIS_sum',
    'HALLMARK_NOTCH_SIGNALING_sum', 'HALLMARK_OXIDATIVE_PHOSPHORYLATION_sum',
    'HALLMARK_P53_PATHWAY_sum', 'HALLMARK_PANCREAS_BETA_CELLS_sum',
    'HALLMARK_PEROXISOME_sum', 'HALLMARK_PI3K_AKT_MTOR_SIGNALING_sum',
    'HALLMARK_PROTEIN_SECRETION_sum', 'HALLMARK_REACTIVE_OXYGEN_SPECIES_PATHWAY_sum',
    'HALLMARK_SPERMATOGENESIS_sum', 'HALLMARK_TGF_BETA_SIGNALING_sum',
    'HALLMARK_TNFA_SIGNALING_VIA_NFKB_sum', 'HALLMARK_UNFOLDED_PROTEIN_RESPONSE_sum',
    'HALLMARK_UV_RESPONSE_DN_sum', 'HALLMARK_UV_RESPONSE_UP_sum',
    'HALLMARK_WNT_BETA_CATENIN_SIGNALING_sum', 'HALLMARK_XENOBIOTIC_METABOLISM_sum',
]
N_CLS_OUT = sum(CLASSIFICATION_DICT.values())          # 33
N_REG_OUT = len(REGRESSION_LIST)                       # 55
HEAD_OUT = N_CLS_OUT + N_REG_OUT                       # 88


def _xavier(key, fan_in, fan_out):
    bound = (6.0 / (fan_in + fan_out)) ** 0.5
    return jax.random.uniform(key, (fan_in, fan_out), jnp.float32, -bound, bound)


def init_params(key):
    ks = jax.random.split(key, 6 + len(CLASSIFICATION_DICT) + len(REGRESSION_LIST))
    i = 0
    # attention_net[0]: Linear(512, 256)
    w1 = _xavier(ks[i], L_IN, D); i += 1
    # Attn_Net_Gated: attention_a / attention_b Linear(256, 256) fused -> (256, 512)
    wa = _xavier(ks[i], D, D); i += 1
    wb = _xavier(ks[i], D, D); i += 1
    # attention_c: Linear(256, 1) kept as an f32 row (VPU path, not MXU)
    wc = _xavier(ks[i], D, 1); i += 1
    # rho: Linear(256, 256)
    wr = _xavier(ks[i], D, D); i += 1
    i += 1  # reserved key (parity with the original 6-key split)
    # fused classifier + regressor heads: (256, 88) padded to lane-dense (256, 128)
    head_ws = []
    for n_cls in CLASSIFICATION_DICT.values():
        head_ws.append(_xavier(ks[i], D, n_cls)); i += 1
    for _ in REGRESSION_LIST:
        head_ws.append(_xavier(ks[i], D, 1)); i += 1
    wh = jnp.pad(jnp.concatenate(head_ws, axis=1), ((0, 0), (0, HEAD_PAD - HEAD_OUT)))

    # packed f32 side row: biases are all zero (PyTorch init), wc row at OFF_WC
    side = jnp.zeros((1, SIDE_W), jnp.float32)
    side = side.at[:, OFF_WC:OFF_WC + D].set(jnp.transpose(wc))

    return {
        'w1': w1.astype(jnp.bfloat16),                                   # (512, 256)
        'wab': jnp.concatenate([wa, wb], axis=1).astype(jnp.bfloat16),   # (256, 512)
        'wr': wr.astype(jnp.bfloat16),                                   # (256, 256)
        'wh': wh.astype(jnp.bfloat16),                                   # (256, 128)
        'side': side,                                                    # (1, 1536) f32
    }


def _attention_model_kernel(x_ref, w1_ref, wab_ref, wr_ref, wh_ref, side_ref, out_ref):
    n = x_ref.shape[0]
    att_pad = out_ref.shape[-1] - D - HEAD_PAD

    # unpack the lane-dense f32 side row (static, 128-aligned slices)
    b1 = side_ref[:, OFF_B1:OFF_B1 + D]                                 # (1, 256)
    bab = side_ref[:, OFF_BAB:OFF_BAB + 2 * D]                          # (1, 512)
    wc = side_ref[:, OFF_WC:OFF_WC + D]                                 # (1, 256)
    br = side_ref[:, OFF_BR:OFF_BR + D]                                 # (1, 256)
    bh = side_ref[:, OFF_BH:OFF_BH + HEAD_PAD]                          # (1, 128)
    bc = side_ref[:, OFF_BC:OFF_BC + 1]                                 # (1, 1)

    x = x_ref[...]                                                      # (N, 512) bf16
    # attention_net: Linear(512,256) + ReLU  (dropout = identity in eval)
    h = jnp.dot(x, w1_ref[...], preferred_element_type=jnp.float32) + b1
    h = jnp.maximum(h, 0.0)                                             # (N, 256) f32

    # Attn_Net_Gated: fused (a | b) projection, then tanh / sigmoid gate
    ab = jnp.dot(h.astype(jnp.bfloat16), wab_ref[...],
                 preferred_element_type=jnp.float32) + bab              # (N, 512)
    a = jnp.tanh(ab[:, :D])
    g = jax.nn.sigmoid(ab[:, D:])
    # attention_c as a VPU multiply + lane reduce (avoids degenerate (256,1) MXU shape)
    A = jnp.sum((a * g) * wc, axis=-1, keepdims=True) + bc              # (N, 1)

    # exact softmax over the instance axis (PyTorch: transpose to (1,N), softmax(dim=1))
    m = jnp.max(A, axis=0, keepdims=True)
    e = jnp.exp(A - m)
    w = e / jnp.sum(e, axis=0, keepdims=True)                           # (N, 1)

    # attention pooling: (1,N) @ (N,256) == sum_n w[n] * h[n]
    pooled = jnp.sum(w * h, axis=0, keepdims=True)                      # (1, 256)

    # rho: Linear(256,256) + ReLU
    h2 = jnp.dot(pooled.astype(jnp.bfloat16), wr_ref[...],
                 preferred_element_type=jnp.float32) + br
    h2 = jnp.maximum(h2, 0.0)                                           # (1, 256)

    # fused classification + regression heads (lane-padded to 128 cols)
    logits = jnp.dot(h2.astype(jnp.bfloat16), wh_ref[...],
                     preferred_element_type=jnp.float32) + bh           # (1, 128)

    # scatter the (N,1) attention weights onto the lane axis -> lane-dense (1, att_pad)
    # (cheap VPU ops; no vector slot is anywhere near saturation in this kernel)
    lane = jax.lax.broadcasted_iota(jnp.int32, (n, att_pad), 1)
    row = jax.lax.broadcasted_iota(jnp.int32, (n, att_pad), 0)
    attn_row = jnp.sum(jnp.where(lane == row, w, 0.0), axis=0, keepdims=True)

    # single packed lane-dense output row: [pooled(256) | logits(128) | attention(att_pad)]
    out_ref[:, 0:D] = pooled
    out_ref[:, D:D + HEAD_PAD] = logits
    out_ref[:, D + HEAD_PAD:] = attn_row


def attention_model_forward(x, params):
    """x: (n_bags, N, L) float32.  n_bags == 1 reproduces the PyTorch forward
    (x.squeeze(0)); n_bags > 1 runs one bag per grid step with the bf16 weights
    kept VMEM-resident across bags (constant-index BlockSpecs)."""
    x = jnp.asarray(x)
    n_bags, n, _ = x.shape
    xb = x.astype(jnp.bfloat16)                     # halve activation HBM bytes; MXU-native
    att_pad = max(128, -(-n // 128) * 128)
    out_w = D + HEAD_PAD + att_pad

    w1, wab, wr, wh, side = (params['w1'], params['wab'], params['wr'],
                             params['wh'], params['side'])

    flops_per_bag = 2 * (n * L_IN * D + n * D * 2 * D + n * D + D * D + D * HEAD_PAD)
    transc_per_bag = 2 * n * D + n                  # tanh + sigmoid + exp
    bytes_accessed = (w1.nbytes + wab.nbytes + wr.nbytes + wh.nbytes + side.nbytes
                      + xb.nbytes + n_bags * out_w * 4)

    packed = pl.pallas_call(
        _attention_model_kernel,
        grid=(n_bags,),
        in_specs=[
            # per-bag activations (bag dim squeezed out of the kernel view)
            pl.BlockSpec((None, n, L_IN), lambda b: (b, 0, 0)),
            # weights: constant block index -> DMA'd once, VMEM-resident across bags
            pl.BlockSpec((L_IN, D), lambda b: (0, 0)),
            pl.BlockSpec((D, 2 * D), lambda b: (0, 0)),
            pl.BlockSpec((D, D), lambda b: (0, 0)),
            pl.BlockSpec((D, HEAD_PAD), lambda b: (0, 0)),
            pl.BlockSpec((1, SIDE_W), lambda b: (0, 0)),
        ],
        out_specs=pl.BlockSpec((None, 1, out_w), lambda b: (b, 0, 0)),
        out_shape=jax.ShapeDtypeStruct((n_bags, 1, out_w), jnp.float32),
        compiler_params=pltpu.CompilerParams(
            dimension_semantics=("parallel",),          # bag axis -> both TCs on v7x
            vmem_limit_bytes=32 * 1024 * 1024),         # explicit; well inside v7x's 64 MiB
        cost_estimate=pl.CostEstimate(
            flops=n_bags * flops_per_bag,
            transcendentals=n_bags * transc_per_bag,
            bytes_accessed=bytes_accessed),
    )(xb, w1, wab, wr, wh, side)

    packed = packed[:, 0, :]                            # (n_bags, out_w)

    results = {
        'global_feat': packed[:, :D],                               # (n_bags, 256)
        'A': packed[:, D + HEAD_PAD:D + HEAD_PAD + n],              # (n_bags, N) softmaxed
    }
    head_logits = packed[:, D:D + HEAD_OUT]                         # (n_bags, 88)
    off = 0
    for k, n_cls in CLASSIFICATION_DICT.items():
        results[k + '_logits'] = head_logits[:, off:off + n_cls]    # (n_bags, n_cls)
        off += n_cls
    for k in REGRESSION_LIST:
        results[k + '_logits'] = head_logits[:, off]                # (n_bags,) after squeeze
        off += 1
    return results


if __name__ == "__main__":
    key = jax.random.PRNGKey(0)
    pkey, xkey = jax.random.split(key)
    params = init_params(pkey)

    # single bag — mirrors the PyTorch forward (x.squeeze(0))
    x = jax.random.normal(xkey, (1, N_TOKENS, L_IN), jnp.float32)
    results = jax.block_until_ready(attention_model_forward(x, params))

    assert results['global_feat'].shape == (1, D)
    assert results['A'].shape == (1, N_TOKENS)
    assert abs(float(jnp.sum(results['A'])) - 1.0) < 1e-5      # exact softmax now
    assert results['CDH1_cls_logits'].shape == (1, 3)
    assert results['Cytotoxic_T_Lymphocyte_logits'].shape == (1,)

    # multi-bag path: bag grid axis, weights stay VMEM-resident across bags
    x_bags = jnp.concatenate([x, 2.0 * x, -x], axis=0)         # (3, N, L)
    rb = jax.block_until_ready(attention_model_forward(x_bags, params))
    assert rb['global_feat'].shape == (3, D)
    assert rb['A'].shape == (3, N_TOKENS)
    assert jnp.allclose(rb['global_feat'][0], results['global_feat'][0],
                        atol=1e-5, rtol=1e-5)

    print("KERNEL_OK")
</pallas_src>

<mosaic_0001>
module attributes {stable_mosaic.version = 11 : i64} {
  func.func @_attention_model_kernel(%arg0: i32, %arg1: memref<1x8x512xbf16, #tpu.memory_space<vmem>>, %arg2: memref<512x256xbf16, #tpu.memory_space<vmem>>, %arg3: memref<256x512xbf16, #tpu.memory_space<vmem>>, %arg4: memref<256x256xbf16, #tpu.memory_space<vmem>>, %arg5: memref<256x128xbf16, #tpu.memory_space<vmem>>, %arg6: memref<1x1536xf32, #tpu.memory_space<vmem>>, %arg7: memref<1x1x512xf32, #tpu.memory_space<vmem>>) attributes {dimension_semantics = [#tpu.dimension_semantics<parallel>], iteration_bounds = array<i64: 1>, scalar_prefetch = 0 : i64, scratch_operands = 0 : i64, tpu.core_type = #tpu.core_type<tc>, window_params = [{transform_indices = @transform_0, window_bounds = array<i64: 1, 8, 512>}, {pipeline_mode = #tpu.pipeline_mode<synchronous>, transform_indices = @transform_1, window_bounds = array<i64: 512, 256>}, {pipeline_mode = #tpu.pipeline_mode<synchronous>, transform_indices = @transform_2, window_bounds = array<i64: 256, 512>}, {pipeline_mode = #tpu.pipeline_mode<synchronous>, transform_indices = @transform_3, window_bounds = array<i64: 256, 256>}, {pipeline_mode = #tpu.pipeline_mode<synchronous>, transform_indices = @transform_4, window_bounds = array<i64: 256, 128>}, {pipeline_mode = #tpu.pipeline_mode<synchronous>, transform_indices = @transform_5, window_bounds = array<i64: 1, 1536>}, {transform_indices = @transform_6, window_bounds = array<i64: 1, 1, 512>}]} {
    %c0 = arith.constant 0 : index
    %c0_0 = arith.constant 0 : index
    %0 = vector.load %arg6[%c0, %c0_0] : memref<1x1536xf32, #tpu.memory_space<vmem>>, vector<1x256xf32>
    %c0_1 = arith.constant 0 : index
    %c256 = arith.constant 256 : index
    %1 = vector.load %arg6[%c0_1, %c256] : memref<1x1536xf32, #tpu.memory_space<vmem>>, vector<1x512xf32>
    %c0_2 = arith.constant 0 : index
    %c768 = arith.constant 768 : index
    %2 = vector.load %arg6[%c0_2, %c768] : memref<1x1536xf32, #tpu.memory_space<vmem>>, vector<1x256xf32>
    %c0_3 = arith.constant 0 : index
    %c1024 = arith.constant 1024 : index
    %3 = vector.load %arg6[%c0_3, %c1024] : memref<1x1536xf32, #tpu.memory_space<vmem>>, vector<1x256xf32>
    %c0_4 = arith.constant 0 : index
    %c1280 = arith.constant 1280 : index
    %4 = vector.load %arg6[%c0_4, %c1280] : memref<1x1536xf32, #tpu.memory_space<vmem>>, vector<1x128xf32>
    %c0_5 = arith.constant 0 : index
    %c1408 = arith.constant 1408 : index
    %5 = vector.load %arg6[%c0_5, %c1408] : memref<1x1536xf32, #tpu.memory_space<vmem>>, vector<1x1xf32>
    %c0_6 = arith.constant 0 : index
    %c0_7 = arith.constant 0 : index
    %c0_8 = arith.constant 0 : index
    %6 = vector.load %arg1[%c0_6, %c0_7, %c0_8] : memref<1x8x512xbf16, #tpu.memory_space<vmem>>, vector<1x8x512xbf16>
    %7 = vector.shape_cast %6 : vector<1x8x512xbf16> to vector<8x512xbf16>
    %c0_9 = arith.constant 0 : index
    %c0_10 = arith.constant 0 : index
    %8 = vector.load %arg2[%c0_9, %c0_10] : memref<512x256xbf16, #tpu.memory_space<vmem>>, vector<512x256xbf16>
    %cst = arith.constant dense<0.000000e+00> : vector<8x256xf32>
    %9 = tpu.matmul %7, %8, %cst {dimension_numbers = #tpu.dot_dimension_numbers<[1], [0], [0], [1], [0, 0, 1, 1], [], []>} : vector<8x512xbf16>, vector<512x256xbf16>, vector<8x256xf32> -> vector<8x256xf32>
    %10 = vector.broadcast %0 : vector<1x256xf32> to vector<8x256xf32>
    %11 = arith.addf %9, %10 : vector<8x256xf32>
    %cst_11 = arith.constant 0.000000e+00 : f32
    %12 = vector.broadcast %cst_11 : f32 to vector<8x256xf32>
    %13 = arith.maximumf %11, %12 : vector<8x256xf32>
    %14 = arith.truncf %13 : vector<8x256xf32> to vector<8x256xbf16>
    %c0_12 = arith.constant 0 : index
    %c0_13 = arith.constant 0 : index
    %15 = vector.load %arg3[%c0_12, %c0_13] : memref<256x512xbf16, #tpu.memory_space<vmem>>, vector<256x512xbf16>
    %cst_14 = arith.constant dense<0.000000e+00> : vector<8x512xf32>
    %16 = tpu.matmul %14, %15, %cst_14 {dimension_numbers = #tpu.dot_dimension_numbers<[1], [0], [0], [1], [0, 0, 1, 1], [], []>} : vector<8x256xbf16>, vector<256x512xbf16>, vector<8x512xf32> -> vector<8x512xf32>
    %17 = vector.broadcast %1 : vector<1x512xf32> to vector<8x512xf32>
    %18 = arith.addf %16, %17 : vector<8x512xf32>
    %19 = vector.extract_strided_slice %18 {offsets = [0, 0], sizes = [8, 256], strides = [1, 1]} : vector<8x512xf32> to vector<8x256xf32>
    %20 = math.tanh %19 : vector<8x256xf32>
    %21 = vector.extract_strided_slice %18 {offsets = [0, 256], sizes = [8, 256], strides = [1, 1]} : vector<8x512xf32> to vector<8x256xf32>
    %22 = arith.negf %21 : vector<8x256xf32>
    %23 = math.exp %22 : vector<8x256xf32>
    %cst_15 = arith.constant 1.000000e+00 : f32
    %24 = vector.broadcast %cst_15 : f32 to vector<8x256xf32>
    %25 = arith.addf %24, %23 : vector<8x256xf32>
    %26 = arith.divf %24, %25 : vector<8x256xf32>
    %27 = arith.mulf %20, %26 : vector<8x256xf32>
    %28 = vector.broadcast %2 : vector<1x256xf32> to vector<8x256xf32>
    %29 = arith.mulf %27, %28 : vector<8x256xf32>
    %cst_16 = arith.constant dense<0.000000e+00> : vector<8xf32>
    %30 = vector.multi_reduction <add>, %29, %cst_16 [1] : vector<8x256xf32> to vector<8xf32>
    %31 = vector.shape_cast %30 : vector<8xf32> to vector<8x1xf32>
    %32 = vector.broadcast %5 : vector<1x1xf32> to vector<8x1xf32>
    %33 = arith.addf %31, %32 : vector<8x1xf32>
    %cst_17 = arith.constant dense<0xFF800000> : vector<1xf32>
    %34 = vector.multi_reduction <maximumf>, %33, %cst_17 [0] : vector<8x1xf32> to vector<1xf32>
    %35 = vector.shape_cast %34 : vector<1xf32> to vector<1x1xf32>
    %36 = vector.broadcast %35 : vector<1x1xf32> to vector<8x1xf32>
    %37 = arith.subf %33, %36 : vector<8x1xf32>
    %38 = math.exp %37 : vector<8x1xf32>
    %cst_18 = arith.constant dense<0.000000e+00> : vector<1xf32>
    %39 = vector.multi_reduction <add>, %38, %cst_18 [0] : vector<8x1xf32> to vector<1xf32>
    %40 = vector.shape_cast %39 : vector<1xf32> to vector<1x1xf32>
    %41 = vector.broadcast %40 : vector<1x1xf32> to vector<8x1xf32>
    %42 = arith.divf %38, %41 : vector<8x1xf32>
    %43 = vector.broadcast %42 : vector<8x1xf32> to vector<8x256xf32>
    %44 = arith.mulf %43, %13 : vector<8x256xf32>
    %cst_19 = arith.constant dense<0.000000e+00> : vector<256xf32>
    %45 = vector.multi_reduction <add>, %44, %cst_19 [0] : vector<8x256xf32> to vector<256xf32>
    %46 = vector.shape_cast %45 : vector<256xf32> to vector<1x256xf32>
    %47 = arith.truncf %46 : vector<1x256xf32> to vector<1x256xbf16>
    %c0_20 = arith.constant 0 : index
    %c0_21 = arith.constant 0 : index
    %48 = vector.load %arg4[%c0_20, %c0_21] : memref<256x256xbf16, #tpu.memory_space<vmem>>, vector<256x256xbf16>
    %cst_22 = arith.constant dense<0.000000e+00> : vector<1x256xf32>
    %49 = tpu.matmul %47, %48, %cst_22 {dimension_numbers = #tpu.dot_dimension_numbers<[1], [0], [0], [1], [0, 0, 1, 1], [], []>} : vector<1x256xbf16>, vector<256x256xbf16>, vector<1x256xf32> -> vector<1x256xf32>
    %50 = arith.addf %49, %3 : vector<1x256xf32>
    %cst_23 = arith.constant 0.000000e+00 : f32
    %51 = vector.broadcast %cst_23 : f32 to vector<1x256xf32>
    %52 = arith.maximumf %50, %51 : vector<1x256xf32>
    %53 = arith.truncf %52 : vector<1x256xf32> to vector<1x256xbf16>
    %c0_24 = arith.constant 0 : index
    %c0_25 = arith.constant 0 : index
    %54 = vector.load %arg5[%c0_24, %c0_25] : memref<256x128xbf16, #tpu.memory_space<vmem>>, vector<256x128xbf16>
    %cst_26 = arith.constant dense<0.000000e+00> : vector<1x128xf32>
    %55 = tpu.matmul %53, %54, %cst_26 {dimension_numbers = #tpu.dot_dimension_numbers<[1], [0], [0], [1], [0, 0, 1, 1], [], []>} : vector<1x256xbf16>, vector<256x128xbf16>, vector<1x128xf32> -> vector<1x128xf32>
    %56 = arith.addf %55, %4 : vector<1x128xf32>
    %57 = tpu.iota {dimensions = array<i32: 1>} : vector<8x128xi32>
    %58 = tpu.iota {dimensions = array<i32: 0>} : vector<8x128xi32>
    %59 = arith.cmpi eq, %57, %58 : vector<8x128xi32>
    %cst_27 = arith.constant 0.000000e+00 : f32
    %60 = vector.shape_cast %42 : vector<8x1xf32> to vector<8x1xf32>
    %61 = vector.broadcast %60 : vector<8x1xf32> to vector<8x128xf32>
    %62 = vector.broadcast %cst_27 : f32 to vector<8x128xf32>
    %63 = arith.select %59, %61, %62 : vector<8x128xi1>, vector<8x128xf32>
    %cst_28 = arith.constant dense<0.000000e+00> : vector<128xf32>
    %64 = vector.multi_reduction <add>, %63, %cst_28 [0] : vector<8x128xf32> to vector<128xf32>
    %65 = vector.shape_cast %64 : vector<128xf32> to vector<1x128xf32>
    %c0_29 = arith.constant 0 : index
    %c0_30 = arith.constant 0 : index
    %c0_31 = arith.constant 0 : index
    %66 = vector.load %arg7[%c0_29, %c0_30, %c0_31] : memref<1x1x512xf32, #tpu.memory_space<vmem>>, vector<1x1x256xf32>
    %67 = vector.shape_cast %66 : vector<1x1x256xf32> to vector<1x256xf32>
    %68 = vector.shape_cast %46 : vector<1x256xf32> to vector<1x1x256xf32>
    tpu.vector_store %arg7[%c0_29, %c0_30, %c0_31], %68 {strides = array<i32>} : memref<1x1x512xf32, #tpu.memory_space<vmem>>, vector<1x1x256xf32>,
    %c0_32 = arith.constant 0 : index
    %c0_33 = arith.constant 0 : index
    %c256_34 = arith.constant 256 : index
    %69 = vector.load %arg7[%c0_32, %c0_33, %c256_34] : memref<1x1x512xf32, #tpu.memory_space<vmem>>, vector<1x1x128xf32>
    %70 = vector.shape_cast %69 : vector<1x1x128xf32> to vector<1x128xf32>
    %71 = vector.shape_cast %56 : vector<1x128xf32> to vector<1x1x128xf32>
    tpu.vector_store %arg7[%c0_32, %c0_33, %c256_34], %71 {strides = array<i32>} : memref<1x1x512xf32, #tpu.memory_space<vmem>>, vector<1x1x128xf32>,
    %c0_35 = arith.constant 0 : index
    %c0_36 = arith.constant 0 : index
    %c384 = arith.constant 384 : index
    %72 = vector.load %arg7[%c0_35, %c0_36, %c384] : memref<1x1x512xf32, #tpu.memory_space<vmem>>, vector<1x1x128xf32>
    %73 = vector.shape_cast %72 : vector<1x1x128xf32> to vector<1x128xf32>
    %74 = vector.shape_cast %65 : vector<1x128xf32> to vector<1x1x128xf32>
    tpu.vector_store %arg7[%c0_35, %c0_36, %c384], %74 {strides = array<i32>} : memref<1x1x512xf32, #tpu.memory_space<vmem>>, vector<1x1x128xf32>,
    return
  }
  func.func @transform_0(%arg0: i32) -> (i32, i32, i32) {
    %c0_i32 = arith.constant 0 : i32
    %c0_i32_0 = arith.constant 0 : i32
    %c0_i32_1 = arith.constant 0 : i32
    return %arg0, %c0_i32, %c0_i32_0 : i32, i32, i32
  }
  func.func @transform_1(%arg0: i32) -> (i32, i32) {
    %c0_i32 = arith.constant 0 : i32
    %c0_i32_0 = arith.constant 0 : i32
    %c0_i32_1 = arith.constant 0 : i32
    return %c0_i32, %c0_i32_0 : i32, i32
  }
  func.func @transform_2(%arg0: i32) -> (i32, i32) {
    %c0_i32 = arith.constant 0 : i32
    %c0_i32_0 = arith.constant 0 : i32
    %c0_i32_1 = arith.constant 0 : i32
    return %c0_i32, %c0_i32_0 : i32, i32
  }
  func.func @transform_3(%arg0: i32) -> (i32, i32) {
    %c0_i32 = arith.constant 0 : i32
    %c0_i32_0 = arith.constant 0 : i32
    %c0_i32_1 = arith.constant 0 : i32
    return %c0_i32, %c0_i32_0 : i32, i32
  }
  func.func @transform_4(%arg0: i32) -> (i32, i32) {
    %c0_i32 = arith.constant 0 : i32
    %c0_i32_0 = arith.constant 0 : i32
    %c0_i32_1 = arith.constant 0 : i32
    return %c0_i32, %c0_i32_0 : i32, i32
  }
  func.func @transform_5(%arg0: i32) -> (i32, i32) {
    %c0_i32 = arith.constant 0 : i32
    %c0_i32_0 = arith.constant 0 : i32
    %c0_i32_1 = arith.constant 0 : i32
    return %c0_i32, %c0_i32_0 : i32, i32
  }
  func.func @transform_6(%arg0: i32) -> (i32, i32, i32) {
    %c0_i32 = arith.constant 0 : i32
    %c0_i32_0 = arith.constant 0 : i32
    %c0_i32_1 = arith.constant 0 : i32
    return %arg0, %c0_i32, %c0_i32_0 : i32, i32, i32
  }
}

</mosaic_0001>

<bundles_post_ra>
// kernel: tpu_custom_call.1
= control target key start
LH: loop header
LB: loop body
LE: loop exit
PB: predicated region body
PF: predicated region fallthrough
CT: control target
= control target key end

     0   :  { %11 = vsyncpa [#allocation3], 0  ;;  %s2900_s0 = inlined_call_operand.hbm [shape: bf16[1,8,512], index: 0, kind: input, shape index: {}]   ;;  %s2901_s1 = inlined_call_operand.hbm [shape: bf16[512,256], index: 1, kind: input, shape index: {}]   ;;  %s2902_s2 = inlined_call_operand.hbm [shape: bf16[256,512], index: 2, kind: input, shape index: {}]   ;;  %s2903_s3 = inlined_call_operand.hbm [shape: bf16[256,256], index: 3, kind: input, shape index: {}]   ;;  %s2904_s4 = inlined_call_operand.hbm [shape: bf16[256,128], index: 4, kind: input, shape index: {}]   ;;  %s2905_s5 = inlined_call_operand.hbm [shape: f32[1,1536], index: 5, kind: input, shape index: {}]   ;;  %s2906_s6 = inlined_call_operand.hbm [shape: f32[1,1,512], index: 6, kind: output, shape index: {}]  }
   0x1   :  { %12 = vsyncpa [#allocation6], 0 }
   0x2   :  { %13 = vsyncpa [#allocation9], 0 }
   0x3   :  { %14 = vsyncpa [#allocation12], 0  ;;  %s31_s23 = sshll.u32 %s2901_s1, 4  ;;  %s32_s23 = int_to_ptr.hbm [resolvable:$true] %s31_s23 }
   0x4   :  { %15 = vsyncpa [#allocation4], 0  ;;  %s2786_s24 = smov [#allocation5]   ;;  %s57_s28 = sshll.u32 %s2903_s3, 4  ;;  %s58_s28 = int_to_ptr.hbm [resolvable:$true] %s57_s28 }
   0x5   :  { %s33_s25 = sshll.u32 %s2786_s24, 4  ;;  %s2787_s29 = smov 128   ;;  %s34_s25 = int_to_ptr.vmem [resolvable:$true] %s33_s25 }
   0x6   :  { %s2788_s30 = smov 8   ;;  %s2789_s7 = smov [#allocation8]  }
   0x7   :  { %39 = dma.hbm_to_vmem [thread:$0]  %s32_s23, 8192, %s34_s25, [#allocation6], %s2787_s29, %s2787_s29, %s2788_s30  }
   0x8   :  { %s59_s8 = sshll.u32 %s2789_s7, 4  ;;  %s21_s11 = sshll.u32 %s2900_s0, 4  ;;  %s60_s8 = int_to_ptr.vmem [resolvable:$true] %s59_s8  ;;  %s22_s11 = int_to_ptr.hbm [resolvable:$true] %s21_s11 }
   0x9   :  { %65 = dma.hbm_to_vmem [thread:$0]  %s58_s28, 4096, %s60_s8, [#allocation9], %s2787_s29, %s2787_s29, %s2788_s30  }
   0xa   :  { %s44_s13 = sshll.u32 %s2902_s2, 4  ;;  %s2790_s14 = smov [#allocation2]   ;;  %s45_s13 = int_to_ptr.hbm [resolvable:$true] %s44_s13 }
   0xb   :  { %s23_s15 = sshll.u32 %s2790_s14, 4  ;;  %s2791_s3 = smov [#allocation7]   ;;  %s24_s15 = int_to_ptr.vmem [resolvable:$true] %s23_s15 }
   0xc   :  { %26 = dma.hbm_to_vmem [thread:$0]  %s22_s11, 256, %s24_s15, [#allocation3]  }
   0xd   :  { %s46_s16 = sshll.u32 %s2791_s3, 4  ;;  %s2792_s17 = smov 256   ;;  %s47_s16 = int_to_ptr.vmem [resolvable:$true] %s46_s16 }
   0xe   :  { %s2793_s18 = smov 16   ;;  %s70_s20 = sshll.u32 %s2904_s4, 4  ;;  %s71_s20 = int_to_ptr.hbm [resolvable:$true] %s70_s20 }
   0xf   :  { %52 = dma.hbm_to_vmem [thread:$0]  %s45_s13, 8192, %s47_s16, [#allocation6], %s2792_s17, %s2792_s17, %s2793_s18  }
  0x10   :  { %s2794_s21 = smov [#allocation10]   ;;  %s84_s24 = sshll.u32 %s2905_s5, 4  ;;  %s85_s24 = int_to_ptr.hbm [resolvable:$true] %s84_s24 }
  0x11   :  { %s72_s22 = sshll.u32 %s2794_s21, 4  ;;  %s2795_s25 = smov 64   ;;  %s73_s22 = int_to_ptr.vmem [resolvable:$true] %s72_s22 }
  0x12   :  { %s2796_s26 = smov 4   ;;  %s2797_s27 = smov [#allocation11]  }
  0x13   :  { %78 = dma.hbm_to_vmem [thread:$0]  %s71_s20, 2048, %s73_s22, [#allocation9], %s2795_s25, %s2795_s25, %s2796_s26  }
  0x14   :  { %s86_s28 = sshll.u32 %s2797_s27, 4  ;;  %s87_s28 = int_to_ptr.vmem [resolvable:$true] %s86_s28 }
  0x15   :  { %89 = dma.hbm_to_vmem [thread:$0]  %s85_s24, 192, %s87_s28, [#allocation12]  }
  0x16   :  { %2776 = dma.done.wait [#allocation3], 256  }
  0x17   :  { %2777 = vsyncadd [#allocation3], 4294967040 }
  0x18   :  { %2778 = dma.done.wait [#allocation6], 16384  }
  0x19   :  { %2779 = vsyncadd [#allocation6], 4294950912 }
  0x1a   :  { %2780 = dma.done.wait [#allocation9], 6144  }
  0x1b   :  { %2781 = vsyncadd [#allocation9], 4294961152 }
  0x1c   :  { %2782 = dma.done.wait [#allocation12], 192  }
  0x1d   :  { %2783 = vsyncadd [#allocation12], 4294967104  ;;  %v1752_v0 = vld [vmem:[#allocation5 + $0x70] sm:$0xf]  ;;  %v2415_v1 = vld [vmem:[#allocation5 + $0x74] sm:$0xf0] }
  0x1e   :  { %v1816_v2 = vld [vmem:[#allocation5 + $0xf0] sm:$0xf]  ;;  %v1753_v3 = vor.u32 %v2415_v1, %v1752_v0  ;;  %v2431_v4 = vld [vmem:[#allocation5 + $0xf4] sm:$0xf0]  ;;  %v1744_v11 = vld [vmem:[#allocation5 + $0x60] sm:$0xf] }
  0x1f   :  { %v1880_v5 = vld [vmem:[#allocation5 + $0x170] sm:$0xf]  ;;  %v2447_v6 = vld [vmem:[#allocation5 + $0x174] sm:$0xf0]  ;;  %v1817_v7 = vor.u32 %v2431_v4, %v1816_v2  ;;  %v2413_v13 = vld [vmem:[#allocation5 + $0x64] sm:$0xf0] }
  0x20   :  { %v1881_v8 = vor.u32 %v2447_v6, %v1880_v5  ;;  %v1944_v9 = vld [vmem:[#allocation5 + $0x1f0] sm:$0xf]  ;;  %v2463_v10 = vld [vmem:[#allocation5 + $0x1f4] sm:$0xf0]  ;;  %525 = vmatpush.bf16.msra.mxu0 %v1753_v3  ;;  %v1808_v14 = vld [vmem:[#allocation5 + $0xe0] sm:$0xf]  ;;  %v1745_v16 = vor.u32 %v2413_v13, %v1744_v11 }
  0x21   :  { %v1945_v12 = vor.u32 %v2463_v10, %v1944_v9  ;;  %v2429_v15 = vld [vmem:[#allocation5 + $0xe4] sm:$0xf0]  ;;  %538 = vmatpush.bf16.msra.mxu1 %v1817_v7  ;;  %v1872_v18 = vld [vmem:[#allocation5 + $0x160] sm:$0xf]  ;;  %v1736_v23 = vld [vmem:[#allocation5 + $0x50] sm:$0xf] }
  0x22   :  { %551 = vmatpush.bf16.msra.mxu2 %v1881_v8  ;;  %v1809_v17 = vor.u32 %v2429_v15, %v1808_v14  ;;  %v2445_v19 = vld [vmem:[#allocation5 + $0x164] sm:$0xf0]  ;;  %v1936_v20 = vld [vmem:[#allocation5 + $0x1e0] sm:$0xf]  ;;  %v2411_v24 = vld [vmem:[#allocation5 + $0x54] sm:$0xf0] }
  0x23   :  { %564 = vmatpush.bf16.msra.mxu3 %v1945_v12  ;;  %v1873_v21 = vor.u32 %v2445_v19, %v1872_v18  ;;  %v2461_v22 = vld [vmem:[#allocation5 + $0x1e4] sm:$0xf0]  ;;  %v1800_v26 = vld [vmem:[#allocation5 + $0xd0] sm:$0xf]  ;;  %v2427_v27 = vld [vmem:[#allocation5 + $0xd4] sm:$0xf0]  ;;  %v1737_v29 = vor.u32 %v2411_v24, %v1736_v23 }
  0x24   :  { %v1937_v25 = vor.u32 %v2461_v22, %v1936_v20  ;;  %v1864_v28 = vld [vmem:[#allocation5 + $0x150] sm:$0xf]  ;;  %526 = vmatpush.bf16.msra.mxu0 %v1745_v16  ;;  %v2443_v30 = vld [vmem:[#allocation5 + $0x154] sm:$0xf0]  ;;  %v1801_v33 = vor.u32 %v2427_v27, %v1800_v26  ;;  %v1728_v35 = vld [vmem:[#allocation5 + $0x40] sm:$0xf] }
  0x25   :  { %v1928_v31 = vld [vmem:[#allocation5 + $0x1d0] sm:$0xf]  ;;  %v2459_v32 = vld [vmem:[#allocation5 + $0x1d4] sm:$0xf0]  ;;  %539 = vmatpush.bf16.msra.mxu1 %v1809_v17  ;;  %v1865_v34 = vor.u32 %v2443_v30, %v1864_v28  ;;  %v2409_v36 = vld [vmem:[#allocation5 + $0x44] sm:$0xf0] }
  0x26   :  { %552 = vmatpush.bf16.msra.mxu2 %v1873_v21  ;;  %v1792_v37 = vld [vmem:[#allocation5 + $0xc0] sm:$0xf]  ;;  %v1929_v38 = vor.u32 %v2459_v32, %v1928_v31  ;;  %v2425_v39 = vld [vmem:[#allocation5 + $0xc4] sm:$0xf0]  ;;  %v1729_v44 = vor.u32 %v2409_v36, %v1728_v35  ;;  %v1720_v47 = vld [vmem:[#allocation5 + $0x30] sm:$0xf] }
  0x27   :  { %565 = vmatpush.bf16.msra.mxu3 %v1937_v25  ;;  %v1856_v40 = vld [vmem:[#allocation5 + $0x140] sm:$0xf]  ;;  %v2441_v41 = vld [vmem:[#allocation5 + $0x144] sm:$0xf0]  ;;  %v1793_v45 = vor.u32 %v2425_v39, %v1792_v37  ;;  %v2407_v48 = vld [vmem:[#allocation5 + $0x34] sm:$0xf0] }
  0x28   :  { %v1920_v42 = vld [vmem:[#allocation5 + $0x1c0] sm:$0xf]  ;;  %v2457_v43 = vld [vmem:[#allocation5 + $0x1c4] sm:$0xf0]  ;;  %527 = vmatpush.bf16.msra.mxu0 %v1737_v29  ;;  %v1857_v46 = vor.u32 %v2441_v41, %v1856_v40  ;;  %v1784_v49 = vld [vmem:[#allocation5 + $0xb0] sm:$0xf]  ;;  %v1721_v56 = vor.u32 %v2407_v48, %v1720_v47 }
  0x29   :  { %540 = vmatpush.bf16.msra.mxu1 %v1801_v33  ;;  %v1921_v50 = vor.u32 %v2457_v43, %v1920_v42  ;;  %v2423_v51 = vld [vmem:[#allocation5 + $0xb4] sm:$0xf0]  ;;  %v1848_v52 = vld [vmem:[#allocation5 + $0x130] sm:$0xf]  ;;  %v1712_v59 = vld [vmem:[#allocation5 + $0x20] sm:$0xf] }
  0x2a   :  { %553 = vmatpush.bf16.msra.mxu2 %v1865_v34  ;;  %v2439_v53 = vld [vmem:[#allocation5 + $0x134] sm:$0xf0]  ;;  %v1912_v54 = vld [vmem:[#allocation5 + $0x1b0] sm:$0xf]  ;;  %v1785_v57 = vor.u32 %v2423_v51, %v1784_v49  ;;  %v2405_v60 = vld [vmem:[#allocation5 + $0x24] sm:$0xf0] }
  0x2b   :  { %566 = vmatpush.bf16.msra.mxu3 %v1929_v38  ;;  %v2455_v55 = vld [vmem:[#allocation5 + $0x1b4] sm:$0xf0]  ;;  %v1849_v58 = vor.u32 %v2439_v53, %v1848_v52  ;;  %v1776_v61 = vld [vmem:[#allocation5 + $0xa0] sm:$0xf]  ;;  %v2421_v63 = vld [vmem:[#allocation5 + $0xa4] sm:$0xf0]  ;;  %v1713_v4 = vor.u32 %v2405_v60, %v1712_v59 }
  0x2c   :  { %528 = vmatpush.bf16.msra.mxu0 %v1729_v44  ;;  %v1913_v62 = vor.u32 %v2455_v55, %v1912_v54  ;;  %v1840_v0 = vld [vmem:[#allocation5 + $0x120] sm:$0xf]  ;;  %v2437_v1 = vld [vmem:[#allocation5 + $0x124] sm:$0xf0]  ;;  %v1777_v5 = vor.u32 %v2421_v63, %v1776_v61  ;;  %v1704_v7 = vld [vmem:[#allocation5 + $0x10] sm:$0xf] }
  0x2d   :  { %541 = vmatpush.bf16.msra.mxu1 %v1793_v45  ;;  %v1904_v2 = vld [vmem:[#allocation5 + $0x1a0] sm:$0xf]  ;;  %v2453_v3 = vld [vmem:[#allocation5 + $0x1a4] sm:$0xf0]  ;;  %v1841_v6 = vor.u32 %v2437_v1, %v1840_v0  ;;  %v2403_v8 = vld [vmem:[#allocation5 + $0x14] sm:$0xf0] }
  0x2e   :  { %554 = vmatpush.bf16.msra.mxu2 %v1857_v46  ;;  %v1768_v9 = vld [vmem:[#allocation5 + $0x90] sm:$0xf]  ;;  %v1905_v10 = vor.u32 %v2453_v3, %v1904_v2  ;;  %v2419_v11 = vld [vmem:[#allocation5 + $0x94] sm:$0xf0]  ;;  %v1696_v16 = vld [vmem:[#allocation5] sm:$0xf]  ;;  %v1705_v17 = vor.u32 %v2403_v8, %v1704_v7 }
  0x2f   :  { %567 = vmatpush.bf16.msra.mxu3 %v1921_v50  ;;  %v1832_v12 = vld [vmem:[#allocation5 + $0x110] sm:$0xf]  ;;  %v2435_v13 = vld [vmem:[#allocation5 + $0x114] sm:$0xf0]  ;;  %v2401_v18 = vld [vmem:[#allocation5 + $0x4] sm:$0xf0]  ;;  %v1769_v21 = vor.u32 %v2419_v11, %v1768_v9 }
  0x30   :  { %529 = vmatpush.bf16.msra.mxu0 %v1721_v56  ;;  %v1896_v14 = vld [vmem:[#allocation5 + $0x190] sm:$0xf]  ;;  %v2451_v15 = vld [vmem:[#allocation5 + $0x194] sm:$0xf0]  ;;  %v1760_v19 = vld [vmem:[#allocation5 + $0x80] sm:$0xf]  ;;  %v1833_v22 = vor.u32 %v2435_v13, %v1832_v12  ;;  %v1697_v33 = vor.u32 %v2401_v18, %v1696_v16 }
  0x31   :  { %542 = vmatpush.bf16.msra.mxu1 %v1785_v57  ;;  %v2417_v20 = vld [vmem:[#allocation5 + $0x84] sm:$0xf0]  ;;  %v1824_v23 = vld [vmem:[#allocation5 + $0x100] sm:$0xf]  ;;  %v121_v25 = vld [vmem:[#allocation2 + $0x8] sm:$0xff]  ;;  %v1897_v26 = vor.u32 %v2451_v15, %v1896_v14  ;;  %vm1186_vm8 = vcmask 7168  }
  0x32   :  { %555 = vmatpush.bf16.msra.mxu2 %v1849_v58  ;;  %v2433_v24 = vld [vmem:[#allocation5 + $0x104] sm:$0xf0]  ;;  %v1888_v27 = vld [vmem:[#allocation5 + $0x180] sm:$0xf]  ;;  %v120_v29 = vld [vmem:[#allocation2] sm:$0xff]  ;;  %v195_v37 = vunpack.c.l.b16 %v121_v25  ;;  %v1761_v38 = vor.u32 %v2417_v20, %v1760_v19  ;;  %v196_v43 = vunpack.c.h.b16 %v121_v25  ;;  %vm1662_vm15 = vcmask 1040384  }
  0x33   :  { %568 = vmatpush.bf16.msra.mxu3 %v1913_v62  ;;  %v2449_v28 = vld [vmem:[#allocation5 + $0x184] sm:$0xf0]  ;;  %v2414_v30 = vld [vmem:[#allocation5 + $0x74] sm:$0xf]  ;;  %v1754_v31 = vld [vmem:[#allocation5 + $0x78] sm:$0xf0]  ;;  %v1825_v39 = vor.u32 %v2433_v24, %v1824_v23  ;;  %v193_v42 = vunpack.c.l.b16 %v120_v29  ;;  %v194_v46 = vunpack.c.h.b16 %v120_v29 }
  0x34   :  { %530 = vmatpush.bf16.msra.mxu0 %v1713_v4  ;;  %v2430_v32 = vld [vmem:[#allocation5 + $0xf4] sm:$0xf]  ;;  %v1818_v34 = vld [vmem:[#allocation5 + $0xf8] sm:$0xf0]  ;;  %v1889_v44 = vor.u32 %v2449_v28, %v1888_v27  ;;  %v1757_v45 = vor.u32 %v2414_v30, %v1754_v31  ;;  %v2412_v49 = vld [vmem:[#allocation5 + $0x64] sm:$0xf]  ;;  %v2853_v53 = vpack.c.b16 %v195_v37, %v195_v37  ;;  %v2857_v58 = vpack.c.b16 %v196_v43, %v196_v43 }
  0x35   :  { %543 = vmatpush.bf16.msra.mxu1 %v1777_v5  ;;  %v2446_v35 = vld [vmem:[#allocation5 + $0x174] sm:$0xf]  ;;  %v1882_v36 = vld [vmem:[#allocation5 + $0x178] sm:$0xf0]  ;;  %v1821_v47 = vor.u32 %v2430_v32, %v1818_v34  ;;  %v1746_v50 = vld [vmem:[#allocation5 + $0x68] sm:$0xf0]  ;;  %v2855_v57 = vpack.c.b16 %v193_v42, %v193_v42  ;;  %v2859_v62 = vpack.c.b16 %v194_v46, %v194_v46 }
  0x36   :  { %556 = vmatpush.bf16.msra.mxu2 %v1841_v6  ;;  %v2462_v40 = vld [vmem:[#allocation5 + $0x1f4] sm:$0xf]  ;;  %v1946_v41 = vld [vmem:[#allocation5 + $0x1f8] sm:$0xf0]  ;;  %v1885_v48 = vor.u32 %v2446_v35, %v1882_v36  ;;  %v2428_v51 = vld [vmem:[#allocation5 + $0xe4] sm:$0xf]  ;;  %v1749_v61 = vor.u32 %v2412_v49, %v1746_v50 }
  0x37   :  { %569 = vmatpush.bf16.msra.mxu3 %v1905_v10  ;;  %v1949_v52 = vor.u32 %v2462_v40, %v1946_v41  ;;  %v1810_v54 = vld [vmem:[#allocation5 + $0xe8] sm:$0xf0]  ;;  %v2444_v55 = vld [vmem:[#allocation5 + $0x164] sm:$0xf]  ;;  %v2410_v1 = vld [vmem:[#allocation5 + $0x54] sm:$0xf] }
  0x38   :  { %531 = vmatpush.bf16.msra.mxu0 %v1705_v17  ;;  %v1874_v56 = vld [vmem:[#allocation5 + $0x168] sm:$0xf0]  ;;  %v2460_v59 = vld [vmem:[#allocation5 + $0x1e4] sm:$0xf]  ;;  %v1813_v63 = vor.u32 %v2428_v51, %v1810_v54  ;;  %v1738_v2 = vld [vmem:[#allocation5 + $0x58] sm:$0xf0] }
  0x39   :  { %544 = vmatpush.bf16.msra.mxu1 %v1769_v21  ;;  %v1938_v60 = vld [vmem:[#allocation5 + $0x1e8] sm:$0xf0]  ;;  %v1877_v0 = vor.u32 %v2444_v55, %v1874_v56  ;;  %v2426_v3 = vld [vmem:[#allocation5 + $0xd4] sm:$0xf]  ;;  %v1802_v5 = vld [vmem:[#allocation5 + $0xd8] sm:$0xf0]  ;;  %v1741_v10 = vor.u32 %v2410_v1, %v1738_v2 }
  0x3a   :  { %557 = vmatpush.bf16.msra.mxu2 %v1833_v22  ;;  %v1941_v4 = vor.u32 %v2460_v59, %v1938_v60  ;;  %v2442_v6 = vld [vmem:[#allocation5 + $0x154] sm:$0xf]  ;;  %v1866_v7 = vld [vmem:[#allocation5 + $0x158] sm:$0xf0]  ;;  %v1805_v11 = vor.u32 %v2426_v3, %v1802_v5  ;;  %v2408_v13 = vld [vmem:[#allocation5 + $0x44] sm:$0xf] }
  0x3b   :  { %570 = vmatpush.bf16.msra.mxu3 %v1897_v26  ;;  %v2458_v8 = vld [vmem:[#allocation5 + $0x1d4] sm:$0xf]  ;;  %v1930_v9 = vld [vmem:[#allocation5 + $0x1d8] sm:$0xf0]  ;;  %v1869_v12 = vor.u32 %v2442_v6, %v1866_v7  ;;  %v1730_v14 = vld [vmem:[#allocation5 + $0x48] sm:$0xf0] }
  0x3c   :  { %532 = vmatpush.bf16.msra.mxu0 %v1697_v33  ;;  %v2424_v15 = vld [vmem:[#allocation5 + $0xc4] sm:$0xf]  ;;  %v1933_v16 = vor.u32 %v2458_v8, %v1930_v9  ;;  %v1794_v17 = vld [vmem:[#allocation5 + $0xc8] sm:$0xf0]  ;;  %v1733_v22 = vor.u32 %v2408_v13, %v1730_v14  ;;  %v2406_v25 = vld [vmem:[#allocation5 + $0x34] sm:$0xf] }
  0x3d   :  { %545 = vmatpush.bf16.msra.mxu1 %v1761_v38  ;;  %v2440_v18 = vld [vmem:[#allocation5 + $0x144] sm:$0xf]  ;;  %v1858_v19 = vld [vmem:[#allocation5 + $0x148] sm:$0xf0]  ;;  %v1797_v23 = vor.u32 %v2424_v15, %v1794_v17  ;;  %v1722_v26 = vld [vmem:[#allocation5 + $0x38] sm:$0xf0] }
  0x3e   :  { %558 = vmatpush.bf16.msra.mxu2 %v1825_v39  ;;  %v2456_v20 = vld [vmem:[#allocation5 + $0x1c4] sm:$0xf]  ;;  %v1922_v21 = vld [vmem:[#allocation5 + $0x1c8] sm:$0xf0]  ;;  %v1861_v24 = vor.u32 %v2440_v18, %v1858_v19  ;;  %v2422_v27 = vld [vmem:[#allocation5 + $0xb4] sm:$0xf]  ;;  %v1725_v34 = vor.u32 %v2406_v25, %v1722_v26 }
  0x3f   :  { %571 = vmatpush.bf16.msra.mxu3 %v1889_v44  ;;  %533 = vmatmul.bf16.vlgmr.msra.gmra.mxu0 %v2855_v57  ;;  %v1925_v28 = vor.u32 %v2456_v20, %v1922_v21  ;;  %v1786_v29 = vld [vmem:[#allocation5 + $0xb8] sm:$0xf0]  ;;  %v2438_v30 = vld [vmem:[#allocation5 + $0x134] sm:$0xf]  ;;  %v2404_v37 = vld [vmem:[#allocation5 + $0x24] sm:$0xf] }
  0x40   :  { %577 = vmatpush.bf16.msrb.mxu0 %v1757_v45  ;;  %546 = vmatmul.bf16.vlgmr.msra.gmra.mxu1 %v2859_v62  ;;  %v1850_v31 = vld [vmem:[#allocation5 + $0x138] sm:$0xf0]  ;;  %v2454_v32 = vld [vmem:[#allocation5 + $0x1b4] sm:$0xf]  ;;  %v1789_v35 = vor.u32 %v2422_v27, %v1786_v29  ;;  %v1714_v38 = vld [vmem:[#allocation5 + $0x28] sm:$0xf0] }
  0x41   :  { %590 = vmatpush.bf16.msrb.mxu1 %v1821_v47  ;;  %559 = vmatmul.bf16.vlgmr.msra.gmra.mxu2 %v2853_v53  ;;  %v1914_v33 = vld [vmem:[#allocation5 + $0x1b8] sm:$0xf0]  ;;  %v1853_v36 = vor.u32 %v2438_v30, %v1850_v31  ;;  %v2420_v39 = vld [vmem:[#allocation5 + $0xa4] sm:$0xf]  ;;  %v1778_v41 = vld [vmem:[#allocation5 + $0xa8] sm:$0xf0]  ;;  %v1717_v46 = vor.u32 %v2404_v37, %v1714_v38 }
  0x42   :  { %603 = vmatpush.bf16.msrb.mxu2 %v1885_v48  ;;  %572 = vmatmul.bf16.vlgmr.msra.gmra.mxu3 %v2857_v58  ;;  %v1917_v40 = vor.u32 %v2454_v32, %v1914_v33  ;;  %v2436_v42 = vld [vmem:[#allocation5 + $0x124] sm:$0xf]  ;;  %v1842_v43 = vld [vmem:[#allocation5 + $0x128] sm:$0xf0]  ;;  %v2402_v47 = vld [vmem:[#allocation5 + $0x14] sm:$0xf]  ;;  %v1781_v48 = vor.u32 %v2420_v39, %v1778_v41 }
  0x43   :  { %616 = vmatpush.bf16.msrb.mxu3 %v1949_v52  ;;  %v2452_v44 = vld [vmem:[#allocation5 + $0x1a4] sm:$0xf]  ;;  %v1906_v45 = vld [vmem:[#allocation5 + $0x1a8] sm:$0xf0]  ;;  %v1845_v49 = vor.u32 %v2436_v42, %v1842_v43  ;;  %v1706_v50 = vld [vmem:[#allocation5 + $0x18] sm:$0xf0] }
  0x44   :  { %578 = vmatpush.bf16.msrb.mxu0 %v1749_v61  ;;  %v2418_v51 = vld [vmem:[#allocation5 + $0x94] sm:$0xf]  ;;  %v1909_v52 = vor.u32 %v2452_v44, %v1906_v45  ;;  %v1770_v54 = vld [vmem:[#allocation5 + $0x98] sm:$0xf0]  ;;  %v1709_v61 = vor.u32 %v2402_v47, %v1706_v50  ;;  %v1698_v2 = vld [vmem:[#allocation5 + $0x8] sm:$0xf0] }
  0x45   :  { %591 = vmatpush.bf16.msrb.mxu1 %v1813_v63  ;;  %v2434_v55 = vld [vmem:[#allocation5 + $0x114] sm:$0xf]  ;;  %v1834_v56 = vld [vmem:[#allocation5 + $0x118] sm:$0xf0]  ;;  %v2400_v63 = vld [vmem:[#allocation5 + $0x4] sm:$0xf] }
  0x46   :  { %604 = vmatpush.bf16.msrb.mxu2 %v1877_v0  ;;  %v2450_v59 = vld [vmem:[#allocation5 + $0x194] sm:$0xf]  ;;  %v1898_v60 = vld [vmem:[#allocation5 + $0x198] sm:$0xf0]  ;;  %v1773_v0 = vor.u32 %v2418_v51, %v1770_v54  ;;  %v1837_v1 = vor.u32 %v2434_v55, %v1834_v56  ;;  %v2416_v3 = vld [vmem:[#allocation5 + $0x84] sm:$0xf] }
  0x47   :  { %617 = vmatpush.bf16.msrb.mxu3 %v1941_v4  ;;  %v1762_v4 = vld [vmem:[#allocation5 + $0x88] sm:$0xf0]  ;;  %v1901_v5 = vor.u32 %v2450_v59, %v1898_v60  ;;  %v2432_v6 = vld [vmem:[#allocation5 + $0x104] sm:$0xf]  ;;  %v2066_v14 = vld [vmem:[#allocation7 + $0xf0] sm:$0xf0] }
  0x48   :  { %579 = vmatpush.bf16.msrb.mxu0 %v1741_v10  ;;  %v1826_v7 = vld [vmem:[#allocation5 + $0x108] sm:$0xf0]  ;;  %v2448_v8 = vld [vmem:[#allocation5 + $0x184] sm:$0xf]  ;;  %v2064_v10 = vld [vmem:[#allocation7 + $0xe0] sm:$0xf]  ;;  %v1765_v15 = vor.u32 %v2416_v3, %v1762_v4 }
  0x49   :  { %592 = vmatpush.bf16.msrb.mxu1 %v1805_v11  ;;  %v1890_v9 = vld [vmem:[#allocation5 + $0x188] sm:$0xf0]  ;;  %v2494_v11 = vld [vmem:[#allocation7 + $0xec] sm:$0xf0]  ;;  %v2492_v13 = vld [vmem:[#allocation7 + $0xe4] sm:$0xf] }
  0x4a   :  { %605 = vmatpush.bf16.msrb.mxu2 %v1869_v12  ;;  %v1701_v12 = vor.u32 %v2400_v63, %v1698_v2  ;;  %v1893_v17 = vor.u32 %v2448_v8, %v1890_v9  ;;  %v2065_v18 = vor.u32 %v2494_v11, %v2064_v10  ;;  %v2048_v19 = vld [vmem:[#allocation7 + $0xc0] sm:$0xf]  ;;  %v2490_v20 = vld [vmem:[#allocation7 + $0xcc] sm:$0xf0]  ;;  %v2069_v21 = vor.u32 %v2492_v13, %v2066_v14  ;;  %v2488_v25 = vld [vmem:[#allocation7 + $0xc4] sm:$0xf] }
  0x4b   :  { %618 = vmatpush.bf16.msrb.mxu3 %v1933_v16  ;;  %v1829_v16 = vor.u32 %v2432_v6, %v1826_v7  ;;  %v2050_v26 = vld [vmem:[#allocation7 + $0xd0] sm:$0xf0]  ;;  %v2049_v29 = vor.u32 %v2490_v20, %v2048_v19  ;;  %v2032_v32 = vld [vmem:[#allocation7 + $0xa0] sm:$0xf]  ;;  %v2486_v33 = vld [vmem:[#allocation7 + $0xac] sm:$0xf0] }
  0x4c   :  { %580 = vmatpush.bf16.msrb.mxu0 %v1733_v22  ;;  %v2192_v22 = vld [vmem:[#allocation7 + $0x1e0] sm:$0xf]  ;;  %v2194_v27 = vld [vmem:[#allocation7 + $0x1f0] sm:$0xf0]  ;;  %v2053_v31 = vor.u32 %v2488_v25, %v2050_v26  ;;  %v2480_v39 = vld [vmem:[#allocation7 + $0x84] sm:$0xf] }
  0x4d   :  { %593 = vmatpush.bf16.msrb.mxu1 %v1797_v23  ;;  %v2526_v23 = vld [vmem:[#allocation7 + $0x1ec] sm:$0xf0]  ;;  %v2016_v38 = vld [vmem:[#allocation7 + $0x80] sm:$0xf]  ;;  %v2476_v43 = vld [vmem:[#allocation7 + $0x64] sm:$0xf] }
  0x4e   :  { %606 = vmatpush.bf16.msrb.mxu2 %v1861_v24  ;;  %v2524_v24 = vld [vmem:[#allocation7 + $0x1e4] sm:$0xf]  ;;  %v2000_v42 = vld [vmem:[#allocation7 + $0x60] sm:$0xf]  ;;  %v2002_v44 = vld [vmem:[#allocation7 + $0x70] sm:$0xf0] }
  0x4f   :  { %619 = vmatpush.bf16.msrb.mxu3 %v1925_v28  ;;  %v2193_v28 = vor.u32 %v2526_v23, %v2192_v22  ;;  %v2197_v30 = vor.u32 %v2524_v24, %v2194_v27  ;;  %v2005_v45 = vor.u32 %v2476_v43, %v2002_v44  ;;  %v2474_v47 = vld [vmem:[#allocation7 + $0x4c] sm:$0xf0]  ;;  %v2468_v55 = vld [vmem:[#allocation7 + $0x24] sm:$0xf]  ;;  %v1970_v56 = vld [vmem:[#allocation7 + $0x30] sm:$0xf0] }
  0x50   :  { %581 = vmatpush.bf16.msrb.mxu0 %v1725_v34  ;;  %v2484_v34 = vld [vmem:[#allocation7 + $0xa4] sm:$0xf]  ;;  %v2470_v54 = vld [vmem:[#allocation7 + $0x2c] sm:$0xf0]  ;;  %v1973_v60 = vor.u32 %v2468_v55, %v1970_v56  ;;  %v2072_v2 = vld [vmem:[#allocation7 + $0xe8] sm:$0xf] }
  0x51   :  { %594 = vmatpush.bf16.msrb.mxu1 %v1789_v35  ;;  %v2034_v35 = vld [vmem:[#allocation7 + $0xb0] sm:$0xf0]  ;;  %v2466_v63 = vld [vmem:[#allocation7 + $0xc] sm:$0xf0]  ;;  %v2495_v3 = vld [vmem:[#allocation7 + $0xf4] sm:$0xf0] }
  0x52   :  { %607 = vmatpush.bf16.msrb.mxu2 %v1853_v36  ;;  %v2033_v36 = vor.u32 %v2486_v33, %v2032_v32  ;;  %v2037_v37 = vor.u32 %v2484_v34, %v2034_v35  ;;  %v2493_v4 = vld [vmem:[#allocation7 + $0xec] sm:$0xf]  ;;  %v2073_v8 = vor.u32 %v2495_v3, %v2072_v2  ;;  %v2176_v10 = vld [vmem:[#allocation7 + $0x1c0] sm:$0xf]  ;;  %v2522_v11 = vld [vmem:[#allocation7 + $0x1cc] sm:$0xf0] }
  0x53   :  { %620 = vmatpush.bf16.msrb.mxu3 %v1917_v40  ;;  %v2018_v40 = vld [vmem:[#allocation7 + $0x90] sm:$0xf0]  ;;  %v2177_v13 = vor.u32 %v2522_v11, %v2176_v10  ;;  %v2489_v19 = vld [vmem:[#allocation7 + $0xcc] sm:$0xf]  ;;  %v2058_v20 = vld [vmem:[#allocation7 + $0xd8] sm:$0xf0] }
  0x54   :  { %582 = vmatpush.bf16.msrb.mxu0 %v1717_v46  ;;  %v1984_v46 = vld [vmem:[#allocation7 + $0x40] sm:$0xf]  ;;  %v2178_v14 = vld [vmem:[#allocation7 + $0x1d0] sm:$0xf0]  ;;  %v2518_v23 = vld [vmem:[#allocation7 + $0x1ac] sm:$0xf0] }
  0x55   :  { %595 = vmatpush.bf16.msrb.mxu1 %v1781_v48  ;;  %v2472_v48 = vld [vmem:[#allocation7 + $0x44] sm:$0xf]  ;;  %v1985_v50 = vor.u32 %v2474_v47, %v1984_v46  ;;  %v2160_v22 = vld [vmem:[#allocation7 + $0x1a0] sm:$0xf]  ;;  %v2162_v26 = vld [vmem:[#allocation7 + $0x1b0] sm:$0xf0] }
  0x56   :  { %608 = vmatpush.bf16.msrb.mxu2 %v1845_v49  ;;  %v1986_v49 = vld [vmem:[#allocation7 + $0x50] sm:$0xf0]  ;;  %v2516_v24 = vld [vmem:[#allocation7 + $0x1a4] sm:$0xf]  ;;  %v2161_v25 = vor.u32 %v2518_v23, %v2160_v22  ;;  %v2040_v27 = vld [vmem:[#allocation7 + $0xa8] sm:$0xf] }
  0x57   :  { %621 = vmatpush.bf16.msrb.mxu3 %v1909_v52  ;;  %v1989_v51 = vor.u32 %v2472_v48, %v1986_v49  ;;  %v1968_v52 = vld [vmem:[#allocation7 + $0x20] sm:$0xf]  ;;  %v2042_v32 = vld [vmem:[#allocation7 + $0xb8] sm:$0xf0]  ;;  %v2514_v35 = vld [vmem:[#allocation7 + $0x18c] sm:$0xf0] }
  0x58   :  { %583 = vmatpush.bf16.msrb.mxu0 %v1709_v61  ;;  %v1969_v59 = vor.u32 %v2470_v54, %v1968_v52  ;;  %v1952_v61 = vld [vmem:[#allocation7] sm:$0xf]  ;;  %v2510_v44 = vld [vmem:[#allocation7 + $0x16c] sm:$0xf0]  ;;  %v2130_v46 = vld [vmem:[#allocation7 + $0x170] sm:$0xf0] }
  0x59   :  { %596 = vmatpush.bf16.msrb.mxu1 %v1773_v0  ;;  %v2464_v0 = vld [vmem:[#allocation7 + $0x4] sm:$0xf]  ;;  %v1953_v6 = vor.u32 %v2466_v63, %v1952_v61  ;;  %v2144_v34 = vld [vmem:[#allocation7 + $0x180] sm:$0xf]  ;;  %v2008_v47 = vld [vmem:[#allocation7 + $0x68] sm:$0xf] }
  0x5a   :  { %609 = vmatpush.bf16.msrb.mxu2 %v1837_v1  ;;  %v1954_v1 = vld [vmem:[#allocation7 + $0x10] sm:$0xf0]  ;;  %v2128_v43 = vld [vmem:[#allocation7 + $0x160] sm:$0xf]  ;;  %v2479_v48 = vld [vmem:[#allocation7 + $0x74] sm:$0xf0] }
  0x5b   :  { %622 = vmatpush.bf16.msrb.mxu3 %v1901_v5  ;;  %v2074_v5 = vld [vmem:[#allocation7 + $0xf8] sm:$0xf0]  ;;  %v1957_v7 = vor.u32 %v2464_v0, %v1954_v1  ;;  %v2112_v54 = vld [vmem:[#allocation7 + $0x140] sm:$0xf]  ;;  %v2506_v56 = vld [vmem:[#allocation7 + $0x14c] sm:$0xf0] }
  0x5c   :  { %584 = vmatpush.bf16.msrb.mxu0 %v1701_v12  ;;  %v2077_v9 = vor.u32 %v2493_v4, %v2074_v5  ;;  %v2520_v12 = vld [vmem:[#allocation7 + $0x1c4] sm:$0xf]  ;;  %v2010_v52 = vld [vmem:[#allocation7 + $0x78] sm:$0xf0]  ;;  %v2113_v61 = vor.u32 %v2506_v56, %v2112_v54  ;;  %v1992_v0 = vld [vmem:[#allocation7 + $0x48] sm:$0xf] }
  0x5d   :  { %597 = vmatpush.bf16.msrb.mxu1 %v1765_v15  ;;  %v2056_v15 = vld [vmem:[#allocation7 + $0xc8] sm:$0xf]  ;;  %v2475_v1 = vld [vmem:[#allocation7 + $0x54] sm:$0xf0]  ;;  %v2473_v2 = vld [vmem:[#allocation7 + $0x4c] sm:$0xf] }
  0x5e   :  { %610 = vmatpush.bf16.msrb.mxu2 %v1829_v16  ;;  %v2491_v16 = vld [vmem:[#allocation7 + $0xd4] sm:$0xf0]  ;;  %v1993_v3 = vor.u32 %v2475_v1, %v1992_v0  ;;  %v1994_v4 = vld [vmem:[#allocation7 + $0x58] sm:$0xf0]  ;;  %v2096_v5 = vld [vmem:[#allocation7 + $0x120] sm:$0xf] }
  0x5f   :  { %623 = vmatpush.bf16.msrb.mxu3 %v1893_v17  ;;  %585 = vmatmul.bf16.vlgmr.msrb.gmra.mxu0 %v2855_v57  ;;  %v2482_v57 = vld [vmem:[#allocation7 + $0x8c] sm:$0xf0]  ;;  %v2181_v17 = vor.u32 %v2520_v12, %v2178_v14  ;;  %v1976_v10 = vld [vmem:[#allocation7 + $0x28] sm:$0xf]  ;;  %v2471_v12 = vld [vmem:[#allocation7 + $0x34] sm:$0xf0] }
  0x60   :  { %1026 = vmatpush.bf16.msra.mxu0 %v2065_v18  ;;  %598 = vmatmul.bf16.vlgmr.msrb.gmra.mxu1 %v2859_v62  ;;  %v2017_v41 = vor.u32 %v2482_v57, %v2016_v38  ;;  %v2021_v62 = vor.u32 %v2480_v39, %v2018_v40  ;;  %v2057_v18 = vor.u32 %v2491_v16, %v2056_v15  ;;  %v2146_v38 = vld [vmem:[#allocation7 + $0x190] sm:$0xf0]  ;;  %v2024_v57 = vld [vmem:[#allocation7 + $0x88] sm:$0xf]  ;;  %v2483_v39 = vld [vmem:[#allocation7 + $0x94] sm:$0xf0] }
  0x61   :  { %611 = vmatmul.bf16.vlgmr.msrb.gmra.mxu2 %v2853_v53  ;;  %1039 = vmatpush.bf16.msra.mxu1 %v2193_v28  ;;  %v2478_v53 = vld [vmem:[#allocation7 + $0x6c] sm:$0xf0]  ;;  %v2487_v28 = vld [vmem:[#allocation7 + $0xb4] sm:$0xf0]  ;;  %v1978_v14 = vld [vmem:[#allocation7 + $0x38] sm:$0xf0]  ;;  %v1977_v16 = vor.u32 %v2471_v12, %v1976_v10 }
  0x62   :  { %1052 = vmatpush.bf16.msra.mxu2 %v2069_v21  ;;  %624 = vmatmul.bf16.vlgmr.msrb.gmra.mxu3 %v2857_v58  ;;  %v2001_v58 = vor.u32 %v2478_v53, %v2000_v42  ;;  %v2061_v21 = vor.u32 %v2489_v19, %v2058_v20  ;;  %v2026_v42 = vld [vmem:[#allocation7 + $0x98] sm:$0xf0]  ;;  %v2496_v19 = vld [vmem:[#allocation7 + $0x104] sm:$0xf]  ;;  %v1960_v22 = vld [vmem:[#allocation7 + $0x8] sm:$0xf] }
  0x63   :  { %1065 = vmatpush.bf16.msra.mxu3 %v2197_v30  ;;  %v2041_v30 = vor.u32 %v2487_v28, %v2040_v27  ;;  %v2467_v23 = vld [vmem:[#allocation7 + $0x14] sm:$0xf0]  ;;  %v2869_v27 = vld [vmem:[#allocation11] sm:$0x3]  ;;  %v2152_v54 = vld [vmem:[#allocation7 + $0x188] sm:$0xf] }
  0x64   :  { %1027 = vmatpush.bf16.msra.mxu0 %v2049_v29  ;;  %v2165_v29 = vor.u32 %v2516_v24, %v2162_v26  ;;  %v2465_v24 = vld [vmem:[#allocation7 + $0xc] sm:$0xf]  ;;  %v2507_v10 = vld [vmem:[#allocation7 + $0x154] sm:$0xf0]  ;;  %s2799_s4 = smov [#allocation13]   ;;  %s1681_s7 = sshll.u32 %s2906_s6, 4  ;;  %s1682_s7 = int_to_ptr.hbm [resolvable:$true] %s1681_s7 }
  0x65   :  { %1040 = vmatpush.bf16.msra.mxu1 %v2177_v13  ;;  %v2469_v13 = vld [vmem:[#allocation7 + $0x2c] sm:$0xf]  ;;  %s1679_s5 = sshll.u32 %s2799_s4, 4  ;;  %s1680_s5 = int_to_ptr.vmem [resolvable:$true] %s1679_s5 }
  0x66   :  { %1053 = vmatpush.bf16.msra.mxu2 %v2053_v31  ;;  %v2485_v31 = vld [vmem:[#allocation7 + $0xac] sm:$0xf]  ;;  %v1981_v20 = vor.u32 %v2469_v13, %v1978_v14  ;;  %v2122_v14 = vld [vmem:[#allocation7 + $0x158] sm:$0xf0] }
  0x67   :  { %1066 = vmatpush.bf16.msra.mxu3 %v2181_v17  ;;  %v2045_v33 = vor.u32 %v2485_v31, %v2042_v32  ;;  %v2080_v17 = vld [vmem:[#allocation7 + $0x100] sm:$0xf]  ;;  %v2200_v31 = vld [vmem:[#allocation7 + $0x1e8] sm:$0xf]  ;;  %v2527_v32 = vld [vmem:[#allocation7 + $0x1f4] sm:$0xf0] }
  0x68   :  { %1028 = vmatpush.bf16.msra.mxu0 %v2033_v36  ;;  %v2512_v36 = vld [vmem:[#allocation7 + $0x184] sm:$0xf]  ;;  %v2513_v56 = vld [vmem:[#allocation7 + $0x18c] sm:$0xf] }
  0x69   :  { %1041 = vmatpush.bf16.msra.mxu1 %v2161_v25  ;;  %v2149_v40 = vor.u32 %v2512_v36, %v2146_v38  ;;  %v1962_v25 = vld [vmem:[#allocation7 + $0x18] sm:$0xf0]  ;;  %v187_v36 = vperm.slane %v2869_v27, 0  ;;  %v2184_v38 = vld [vmem:[#allocation7 + $0x1c8] sm:$0xf] }
  0x6a   :  { %1054 = vmatpush.bf16.msra.mxu2 %v2037_v37  ;;  %v2145_v37 = vor.u32 %v2514_v35, %v2144_v34  ;;  %v2201_v34 = vor.u32 %v2527_v32, %v2200_v31  ;;  %v2202_v35 = vld [vmem:[#allocation7 + $0x1f8] sm:$0xf0]  ;;  %v2505_v13 = vld [vmem:[#allocation7 + $0x14c] sm:$0xf]  ;;  %v188_v31 = vperm.slane %v2869_v27, 1 }
  0x6b   :  { %1067 = vmatpush.bf16.msra.mxu3 %v2165_v29  ;;  %v1961_v29 = vor.u32 %v2467_v23, %v1960_v22 }
  0x6c   :  { %1029 = vmatpush.bf16.msra.mxu0 %v2017_v41  ;;  %v2025_v41 = vor.u32 %v2483_v39, %v2024_v57  ;;  %v2523_v57 = vld [vmem:[#allocation7 + $0x1d4] sm:$0xf0]  ;;  %v2521_v39 = vld [vmem:[#allocation7 + $0x1cc] sm:$0xf] }
  0x6d   :  { %1042 = vmatpush.bf16.msra.mxu1 %v2145_v37 }
  0x6e   :  { %1055 = vmatpush.bf16.msra.mxu2 %v2021_v62  ;;  %v2481_v62 = vld [vmem:[#allocation7 + $0x8c] sm:$0xf] }
  0x6f   :  { %v2029_v53 = vor.u32 %v2481_v62, %v2026_v42  ;;  %1068 = vmatpush.bf16.msra.mxu3 %v2149_v40  ;;  %v2186_v62 = vld [vmem:[#allocation7 + $0x1d8] sm:$0xf0] }
  0x70   :  { %1030 = vmatpush.bf16.msra.mxu0 %v2001_v58  ;;  %v2508_v58 = vld [vmem:[#allocation7 + $0x164] sm:$0xf] }
  0x71   :  { %v2133_v49 = vor.u32 %v2508_v58, %v2130_v46  ;;  %v2168_v58 = vld [vmem:[#allocation7 + $0x1a8] sm:$0xf]  ;;  %v2517_v46 = vld [vmem:[#allocation7 + $0x1ac] sm:$0xf] }
  0x72   :  { %1056 = vmatpush.bf16.msra.mxu2 %v2005_v45  ;;  %v2129_v45 = vor.u32 %v2510_v44, %v2128_v43  ;;  %v2189_v43 = vor.u32 %v2521_v39, %v2186_v62 }
  0x73   :  { %1069 = vmatpush.bf16.msra.mxu3 %v2133_v49 }
  0x74   :  { %1031 = vmatpush.bf16.msra.mxu0 %v1985_v50  ;;  %v2009_v50 = vor.u32 %v2479_v48, %v2008_v47  ;;  %1043 = vmatpush.bf16.msra.mxu1 %v2129_v45  ;;  %v2519_v45 = vld [vmem:[#allocation7 + $0x1b4] sm:$0xf0]  ;;  %v2170_v48 = vld [vmem:[#allocation7 + $0x1b8] sm:$0xf0] }
  0x75   :  { %v2169_v47 = vor.u32 %v2519_v45, %v2168_v58 }
  0x76   :  { %1057 = vmatpush.bf16.msra.mxu2 %v1989_v51  ;;  %v2477_v51 = vld [vmem:[#allocation7 + $0x6c] sm:$0xf] }
  0x77   :  { %v2013_v55 = vor.u32 %v2477_v51, %v2010_v52 }
  0x78   :  { %1032 = vmatpush.bf16.msra.mxu0 %v1969_v59  ;;  %v2504_v59 = vld [vmem:[#allocation7 + $0x144] sm:$0xf]  ;;  %1044 = vmatpush.bf16.msra.mxu1 %v2113_v61 }
  0x7a   :  { %1058 = vmatpush.bf16.msra.mxu2 %v1973_v60  ;;  %v2114_v60 = vld [vmem:[#allocation7 + $0x150] sm:$0xf0] }
  0x7b   :  { %v2117_v63 = vor.u32 %v2504_v59, %v2114_v60 }
  0x7c   :  { %1033 = vmatpush.bf16.msra.mxu0 %v1953_v6  ;;  %v2502_v6 = vld [vmem:[#allocation7 + $0x12c] sm:$0xf0] }
  0x7d   :  { %v2097_v11 = vor.u32 %v2502_v6, %v2096_v5  ;;  %1070 = vmatpush.bf16.msra.mxu3 %v2117_v63  ;;  %v2154_v63 = vld [vmem:[#allocation7 + $0x198] sm:$0xf0]  ;;  %v2509_v5 = vld [vmem:[#allocation7 + $0x16c] sm:$0xf] }
  0x7e   :  { %1059 = vmatpush.bf16.msra.mxu2 %v1957_v7  ;;  %v1997_v7 = vor.u32 %v2473_v2, %v1994_v4  ;;  %v2157_v1 = vor.u32 %v2513_v56, %v2154_v63  ;;  %v2511_v4 = vld [vmem:[#allocation7 + $0x174] sm:$0xf0] }
  0x7f   :  { %1045 = vmatpush.bf16.msra.mxu1 %v2097_v11 }
  0x80   :  { %1078 = vmatpush.bf16.msrb.mxu0 %v2073_v8  ;;  %v2500_v8 = vld [vmem:[#allocation7 + $0x124] sm:$0xf] }
  0x82   :  { %1104 = vmatpush.bf16.msrb.mxu2 %v2077_v9  ;;  %v2098_v9 = vld [vmem:[#allocation7 + $0x130] sm:$0xf0] }
  0x83   :  { %v2101_v15 = vor.u32 %v2500_v8, %v2098_v9  ;;  %v2138_v8 = vld [vmem:[#allocation7 + $0x178] sm:$0xf0]  ;;  %v2120_v9 = vld [vmem:[#allocation7 + $0x148] sm:$0xf] }
  0x84   :  { %1079 = vmatpush.bf16.msrb.mxu0 %v2057_v18  ;;  %v2498_v18 = vld [vmem:[#allocation7 + $0x10c] sm:$0xf0]  ;;  %v2141_v12 = vor.u32 %v2509_v5, %v2138_v8 }
  0x85   :  { %v2081_v26 = vor.u32 %v2498_v18, %v2080_v17  ;;  %1071 = vmatpush.bf16.msra.mxu3 %v2101_v15  ;;  %v2125_v17 = vor.u32 %v2505_v13, %v2122_v14  ;;  %v2104_v18 = vld [vmem:[#allocation7 + $0x128] sm:$0xf] }
  0x86   :  { %1105 = vmatpush.bf16.msrb.mxu2 %v2061_v21  ;;  %v2082_v21 = vld [vmem:[#allocation7 + $0x110] sm:$0xf0] }
  0x87   :  { %v2085_v28 = vor.u32 %v2496_v19, %v2082_v21  ;;  %1046 = vmatpush.bf16.msra.mxu1 %v2081_v26  ;;  %v2503_v19 = vld [vmem:[#allocation7 + $0x134] sm:$0xf0]  ;;  %v2106_v21 = vld [vmem:[#allocation7 + $0x138] sm:$0xf0]  ;;  %v2497_v26 = vld [vmem:[#allocation7 + $0x10c] sm:$0xf] }
  0x88   :  { %1080 = vmatpush.bf16.msrb.mxu0 %v2041_v30  ;;  %v1965_v30 = vor.u32 %v2465_v24, %v1962_v25  ;;  %v2105_v22 = vor.u32 %v2503_v19, %v2104_v18  ;;  %v2088_v24 = vld [vmem:[#allocation7 + $0x108] sm:$0xf]  ;;  %v2499_v25 = vld [vmem:[#allocation7 + $0x114] sm:$0xf0] }
  0x89   :  { %1072 = vmatpush.bf16.msra.mxu3 %v2085_v28  ;;  %v2090_v28 = vld [vmem:[#allocation7 + $0x118] sm:$0xf0] }
  0x8a   :  { %1106 = vmatpush.bf16.msrb.mxu2 %v2045_v33  ;;  %v2525_v33 = vld [vmem:[#allocation7 + $0x1ec] sm:$0xf] }
  0x8b   :  { %v2205_v37 = vor.u32 %v2525_v33, %v2202_v35  ;;  %1091 = vmatpush.bf16.msrb.mxu1 %v2201_v34 }
  0x8c   :  { %1081 = vmatpush.bf16.msrb.mxu0 %v2025_v41  ;;  %v2185_v41 = vor.u32 %v2523_v57, %v2184_v38 }
  0x8d   :  { %1117 = vmatpush.bf16.msrb.mxu3 %v2205_v37 }
  0x8e   :  { %1107 = vmatpush.bf16.msrb.mxu2 %v2029_v53 }
  0x8f   :  { %1092 = vmatpush.bf16.msrb.mxu1 %v2185_v41 }
  0x90   :  { %1082 = vmatpush.bf16.msrb.mxu0 %v2009_v50  ;;  %v2173_v50 = vor.u32 %v2517_v46, %v2170_v48 }
  0x91   :  { %1118 = vmatpush.bf16.msrb.mxu3 %v2189_v43 }
  0x92   :  { %1108 = vmatpush.bf16.msrb.mxu2 %v2013_v55  ;;  %v2515_v55 = vld [vmem:[#allocation7 + $0x194] sm:$0xf0] }
  0x93   :  { %1093 = vmatpush.bf16.msrb.mxu1 %v2169_v47  ;;  %v2153_v61 = vor.u32 %v2515_v55, %v2152_v54 }
  0x94   :  { %1083 = vmatpush.bf16.msrb.mxu0 %v1993_v3  ;;  %v2136_v3 = vld [vmem:[#allocation7 + $0x168] sm:$0xf] }
  0x95   :  { %1119 = vmatpush.bf16.msrb.mxu3 %v2173_v50 }
  0x96   :  { %1109 = vmatpush.bf16.msrb.mxu2 %v1997_v7  ;;  %v2137_v7 = vor.u32 %v2511_v4, %v2136_v3 }
  0x97   :  { %1094 = vmatpush.bf16.msrb.mxu1 %v2153_v61 }
  0x98   :  { %1084 = vmatpush.bf16.msrb.mxu0 %v1977_v16  ;;  %v2121_v16 = vor.u32 %v2507_v10, %v2120_v9 }
  0x99   :  { %1120 = vmatpush.bf16.msrb.mxu3 %v2157_v1 }
  0x9a   :  { %1110 = vmatpush.bf16.msrb.mxu2 %v1981_v20  ;;  %v2501_v20 = vld [vmem:[#allocation7 + $0x12c] sm:$0xf] }
  0x9b   :  { %1095 = vmatpush.bf16.msrb.mxu1 %v2137_v7  ;;  %v2109_v23 = vor.u32 %v2501_v20, %v2106_v21 }
  0x9c   :  { %1085 = vmatpush.bf16.msrb.mxu0 %v1961_v29  ;;  %v2089_v29 = vor.u32 %v2499_v25, %v2088_v24 }
  0x9d   :  { %1121 = vmatpush.bf16.msrb.mxu3 %v2141_v12 }
  0x9e   :  { %1111 = vmatpush.bf16.msrb.mxu2 %v1965_v30  ;;  %v2093_v30 = vor.u32 %v2497_v26, %v2090_v28 }
  0x9f   :  { %1096 = vmatpush.bf16.msrb.mxu1 %v2121_v16 }
  0xa1   :  { %1122 = vmatpush.bf16.msrb.mxu3 %v2125_v17 }
  0xa3   :  { %1097 = vmatpush.bf16.msrb.mxu1 %v2105_v22 }
  0xa5   :  { %1123 = vmatpush.bf16.msrb.mxu3 %v2109_v23 }
  0xa7   :  { %1098 = vmatpush.bf16.msrb.mxu1 %v2089_v29 }
  0xa9   :  { %1124 = vmatpush.bf16.msrb.mxu3 %v2093_v30 }
  0xbc   :  { %v534_v40 = vpop.f32.mrf.mxu0 }
  0xbd   :  { %v535_v42 = vadd.f32 %v534_v40, %v187_v36  ;;  %v547_v53 = vpop.f32.mrf.mxu1 }
  0xbf   :  { %v548_v44 = vadd.f32 %v547_v53, %v535_v42 }
  0xc4   :  { %v560_v49 = vpop.f32.mrf.mxu2  ;;  %v536_v60 = vpop.f32.mrf.mxu0 }
  0xc5   :  { %v561_v51 = vadd.f32 %v560_v49, %v548_v44  ;;  %v573_v52 = vpop.f32.mrf.mxu3  ;;  %v549_v0 = vpop.f32.mrf.mxu1 }
  0xc7   :  { %v574_v59 = vadd.f32 %v573_v52, %v561_v51  ;;  %v115_v52 = vld [vmem:[#allocation11 + $0x2] sm:$0xf] }
  0xc8   :  { %v700_v54 = vperm.slane %v115_v52, 2  ;;  %v701_v60 = vperm.slane %v115_v52, 3  ;;  %v698_v10 = vperm.slane %v115_v52, 0  ;;  %v699_v13 = vperm.slane %v115_v52, 1 }
  0xc9   :  { %v2872_v2 = vmax.f32 %v574_v59, 0.0 }
  0xcb   :  { %v631_v6 = vpack.c.bf16 %v2872_v2, %v2872_v2 }
  0xcc   :  { %v562_v11 = vpop.f32.mrf.mxu2 }
  0xcd   :  { %1034 = vmatmul.bf16.vlgmr.msra.gmra.mxu0 %v631_v6  ;;  %1060 = vmatmul.bf16.vlgmr.msra.gmra.mxu2 %v631_v6  ;;  %v575_v15 = vpop.f32.mrf.mxu3 }
  0xdc   :  { %v586_v32 = vpop.f32.mrf.mxu0 }
  0xdd   :  { %v587_v33 = vadd.f32 %v586_v32, %v188_v31  ;;  %v599_v34 = vpop.f32.mrf.mxu1  ;;  %1086 = vmatmul.bf16.vlgmr.msrb.gmra.mxu0 %v631_v6  ;;  %1112 = vmatmul.bf16.vlgmr.msrb.gmra.mxu2 %v631_v6  ;;  %v116_v31 = vld [vmem:[#allocation11 + $0x6] sm:$0x3] }
  0xdf   :  { %v600_v35 = vadd.f32 %v599_v34, %v587_v33 }
  0xe4   :  { %v612_v36 = vpop.f32.mrf.mxu2  ;;  %v588_v57 = vpop.f32.mrf.mxu0 }
  0xe5   :  { %v613_v37 = vadd.f32 %v612_v36, %v600_v35  ;;  %v625_v38 = vpop.f32.mrf.mxu3  ;;  %v601_v39 = vpop.f32.mrf.mxu1 }
  0xe7   :  { %v626_v40 = vadd.f32 %v625_v38, %v613_v37  ;;  %v1173_v38 = vperm.slane %v116_v31, 0 }
  0xe9   :  { %v2877_v41 = vmax.f32 %v626_v40, 0.0  ;;  %v1174_v40 = vperm.slane %v116_v31, 1 }
  0xeb   :  { %v632_v62 = vpack.c.bf16 %v2877_v41, %v2877_v41 }
  0xec   :  { %v614_v27 = vpop.f32.mrf.mxu2 }
  0xed   :  { %v627_v42 = vpop.f32.mrf.mxu3  ;;  %1047 = vmatmul.bf16.vlgmr.msra.gmra.mxu1 %v632_v62  ;;  %1073 = vmatmul.bf16.vlgmr.msra.gmra.mxu3 %v632_v62 }
  0xfd   :  { %1099 = vmatmul.bf16.vlgmr.msrb.gmra.mxu1 %v632_v62  ;;  %1125 = vmatmul.bf16.vlgmr.msrb.gmra.mxu3 %v632_v62 }
 0x14a   :  { %v1035_v53 = vpop.f32.mrf.mxu0 }
 0x14b   :  { %v1036_v15 = vadd.f32 %v1035_v53, %v698_v10 }
 0x150   :  { %v1061_v43 = vpop.f32.mrf.mxu2 }
 0x151   :  { %v1062_v17 = vadd.f32 %v1061_v43, %v699_v13  ;;  %v2258_v13 = vld [vmem:[#allocation8 + $0x60] sm:$0xf] }
 0x152   :  { %v1037_v44 = vpop.f32.mrf.mxu0 }
 0x158   :  { %v1063_v58 = vpop.f32.mrf.mxu2 }
 0x159   :  { %v2591_v58 = vld [vmem:[#allocation11 + $0xb] ss:$0 sm:$0xff] }
 0x15a   :  { %v1087_v45 = vpop.f32.mrf.mxu0 }
 0x15b   :  { %v1088_v56 = vadd.f32 %v1087_v45, %v700_v54 }
 0x160   :  { %v1113_v46 = vpop.f32.mrf.mxu2 }
 0x161   :  { %v1114_v0 = vadd.f32 %v1113_v46, %v701_v60 }
 0x162   :  { %v1089_v47 = vpop.f32.mrf.mxu0 }
 0x168   :  { %v1115_v49 = vpop.f32.mrf.mxu2 }
 0x16a   :  { %v1048_v48 = vpop.f32.mrf.mxu1 }
 0x16b   :  { %v1049_v18 = vadd.f32 %v1048_v48, %v1036_v15 }
 0x170   :  { %v1074_v50 = vpop.f32.mrf.mxu3 }
 0x171   :  { %v1075_v21 = vadd.f32 %v1074_v50, %v1062_v17  ;;  %v2322_v17 = vld [vmem:[#allocation8 + $0xe0] sm:$0xf] }
 0x172   :  { %v1050_v51 = vpop.f32.mrf.mxu1 }
 0x173   :  { %v2798_v51 = vmov 0  }
 0x174   :  { %2590 = vset.pattern.permute.xlu0 %v2798_v51 }
 0x178   :  { %v1076_v55 = vpop.f32.mrf.mxu3 }
 0x17a   :  { %v1100_v59 = vpop.f32.mrf.mxu1 }
 0x17b   :  { %v1101_v61 = vadd.f32 %v1100_v59, %v1088_v56 }
 0x17d   :  { %v2206_v63 = vmul.f32 -1.442695, %v1101_v61 }
 0x17f   :  { %2592 = vpow2.f32 %v2206_v63  ;;  %v2266_v63 = vld [vmem:[#allocation8 + $0x70] sm:$0xf] }
 0x180   :  { %v1126_v1 = vpop.f32.mrf.mxu3 }
 0x181   :  { %v1127_v3 = vadd.f32 %v1126_v1, %v1114_v0  ;;  %v2543_v0 = vld [vmem:[#allocation8 + $0x74] sm:$0xf0] }
 0x182   :  { %v1102_v4 = vpop.f32.mrf.mxu1 }
 0x183   :  { %v2207_v5 = vmul.f32 -1.442695, %v1127_v3  ;;  %v2267_v3 = vor.u32 %v2543_v0, %v2266_v63  ;;  %v2330_v4 = vld [vmem:[#allocation8 + $0xf0] sm:$0xf] }
 0x185   :  { %v2593_v6 = vpop.eup %2592  ;;  %2594 = vpow2.f32 %v2207_v5  ;;  %v2559_v5 = vld [vmem:[#allocation8 + $0xf4] sm:$0xf0]  ;;  %1437 = vmatpush.bf16.msra.mxu0 %v2267_v3 }
 0x186   :  { %v1138_v7 = vadd.f32 1.0, %v2593_v6  ;;  %v2331_v6 = vor.u32 %v2559_v5, %v2330_v4  ;;  %v2234_v4 = vld [vmem:[#allocation8 + $0x30] sm:$0xf]  ;;  %v2535_v5 = vld [vmem:[#allocation8 + $0x34] sm:$0xf0] }
 0x188   :  { %2596 = vrcp.f32 %v1138_v7  ;;  %v1128_v8 = vpop.f32.mrf.mxu3  ;;  %v1151_v22 = vand.u32 2147483648, %v1138_v7  ;;  %vm1145_vm1 = vweird.f32 %v1138_v7  ;;  %v1149_v25 = vand.u32 2147483647, %v1138_v7  ;;  %1450 = vmatpush.bf16.msra.mxu1 %v2331_v6  ;;  %v2298_v6 = vld [vmem:[#allocation8 + $0xb0] sm:$0xf] }
 0x189   :  { %v2268_v8 = vld [vmem:[#allocation8 + $0x78] sm:$0xf0] }
 0x18a   :  { %v1152_v29 = vor.u32 1.1754944e-38, %v1151_v22  ;;  %vm1150_vm3 = vcmp.eq.f32.partialorder %v1149_v25, 8.507059e+37  ;;  %v2260_v22 = vld [vmem:[#allocation8 + $0x68] sm:$0xf0] }
 0x18b   :  { %v2595_v9 = vpop.eup %2594  ;;  %v2324_v25 = vld [vmem:[#allocation8 + $0xe8] sm:$0xf0] }
 0x18c   :  { %v1139_v11 = vadd.f32 1.0, %v2595_v9  ;;  %v2558_v9 = vld [vmem:[#allocation8 + $0xf4] sm:$0xf] }
 0x18e   :  { %v2597_v12 = vpop.eup %2596  ;;  %2598 = vrcp.f32 %v1139_v11  ;;  %v1166_v30 = vand.u32 2147483648, %v1139_v11  ;;  %v1164_v33 = vand.u32 2147483647, %v1139_v11  ;;  %vm1160_vm5 = vweird.f32 %v1139_v11 }
 0x18f   :  { %v1141_v14 = vmul.f32 %v2597_v12, %v1138_v7  ;;  %vm1146_vm0 = vweird.f32 %v2597_v12  ;;  %2600 = vtanh.f32 %v1049_v18  ;;  %v2542_v7 = vld [vmem:[#allocation8 + $0x74] sm:$0xf]  ;;  %v2557_v18 = vld [vmem:[#allocation8 + $0xe4] sm:$0xf0] }
 0x190   :  { %vm1147_vm2 = vmor %vm1145_vm1, %vm1146_vm0  ;;  %2602 = vtanh.f32 %v1075_v21  ;;  %v1167_v37 = vor.u32 1.1754944e-38, %v1166_v30  ;;  %vm1165_vm7 = vcmp.eq.f32.partialorder %v1164_v33, 8.507059e+37  ;;  %v2323_v21 = vor.u32 %v2557_v18, %v2322_v17  ;;  %v2555_v33 = vld [vmem:[#allocation8 + $0xd4] sm:$0xf0]  ;;  %v2533_v17 = vld [vmem:[#allocation8 + $0x24] sm:$0xf0] }
 0x191   :  { %v1142_v16 = vsub.f32 1.0, %v1141_v14  ;;  %v2541_v14 = vld [vmem:[#allocation8 + $0x64] sm:$0xf0]  ;;  %v2290_v18 = vld [vmem:[#allocation8 + $0xa0] sm:$0xf] }
 0x192   :  { %1451 = vmatpush.bf16.msra.mxu1 %v2323_v21  ;;  %v2228_v21 = vld [vmem:[#allocation8 + $0x28] sm:$0xf0] }
 0x193   :  { %v1143_v19 = vmul.f32 %v2597_v12, %v1142_v16  ;;  %v2259_v16 = vor.u32 %v2541_v14, %v2258_v13  ;;  %v2550_v13 = vld [vmem:[#allocation8 + $0xb4] sm:$0xf]  ;;  %v2300_v14 = vld [vmem:[#allocation8 + $0xb8] sm:$0xf0] }
 0x194   :  { %v2599_v20 = vpop.eup %2598 }
 0x195   :  { %v1156_v23 = vmul.f32 %v2599_v20, %v1139_v11  ;;  %v1144_v24 = vadd.f32 %v2597_v12, %v1143_v19  ;;  %vm1161_vm4 = vweird.f32 %v2599_v20  ;;  %v2601_v36 = vpop.eup %2600  ;;  %v2271_v11 = vor.u32 %v2542_v7, %v2268_v8  ;;  %v2540_v19 = vld [vmem:[#allocation8 + $0x64] sm:$0xf]  ;;  %1438 = vmatpush.bf16.msra.mxu0 %v2259_v16  ;;  %v2551_v8 = vld [vmem:[#allocation8 + $0xb4] sm:$0xf0]  ;;  %v2226_v16 = vld [vmem:[#allocation8 + $0x20] sm:$0xf] }
 0x196   :  { %vm1162_vm6 = vmor %vm1160_vm5, %vm1161_vm4  ;;  %v2603_v62 = vpop.eup %2602  ;;  %v2235_v7 = vor.u32 %v2535_v5, %v2234_v4 }
 0x197   :  { %v1148_v26 = vsel %vm1147_vm2, %v2597_v12, %v1144_v24  ;;  %v1157_v28 = vsub.f32 1.0, %v1156_v23  ;;  %v2332_v12 = vld [vmem:[#allocation8 + $0xf8] sm:$0xf0]  ;;  %1463 = vmatpush.bf16.msra.mxu2 %v2271_v11  ;;  %v2556_v23 = vld [vmem:[#allocation8 + $0xe4] sm:$0xf]  ;;  %v2263_v24 = vor.u32 %v2540_v19, %v2260_v22  ;;  %v2299_v11 = vor.u32 %v2551_v8, %v2298_v6 }
 0x198   :  { %v1153_v34 = vsel %vm1150_vm3, %v1152_v29, %v1148_v26  ;;  %v2335_v15 = vor.u32 %v2558_v9, %v2332_v12  ;;  %v2250_v26 = vld [vmem:[#allocation8 + $0x50] sm:$0xf]  ;;  %v2327_v30 = vor.u32 %v2556_v23, %v2324_v25  ;;  %v2534_v9 = vld [vmem:[#allocation8 + $0x34] sm:$0xf]  ;;  %v2549_v19 = vld [vmem:[#allocation8 + $0xa4] sm:$0xf0] }
 0x199   :  { %v1158_v32 = vmul.f32 %v2599_v20, %v1157_v28  ;;  %v1170_v39 = vmul.f32 %v2601_v36, %v1153_v34  ;;  %v2539_v28 = vld [vmem:[#allocation8 + $0x54] sm:$0xf0]  ;;  %v2538_v34 = vld [vmem:[#allocation8 + $0x54] sm:$0xf]  ;;  %v2252_v36 = vld [vmem:[#allocation8 + $0x58] sm:$0xf0]  ;;  %v2291_v22 = vor.u32 %v2549_v19, %v2290_v18 }
 0x19a   :  { %1476 = vmatpush.bf16.msra.mxu3 %v2335_v15  ;;  %v2251_v31 = vor.u32 %v2539_v28, %v2250_v26  ;;  %v2303_v15 = vor.u32 %v2550_v13, %v2300_v14  ;;  %v2292_v25 = vld [vmem:[#allocation8 + $0xa8] sm:$0xf0]  ;;  %v2218_v28 = vld [vmem:[#allocation8 + $0x10] sm:$0xf] }
 0x19b   :  { %v1159_v35 = vadd.f32 %v2599_v20, %v1158_v32  ;;  %v1177_v53 = vmul.f32 %v1173_v38, %v1170_v39  ;;  %v2314_v32 = vld [vmem:[#allocation8 + $0xd0] sm:$0xf]  ;;  %v2316_v38 = vld [vmem:[#allocation8 + $0xd8] sm:$0xf0]  ;;  %1464 = vmatpush.bf16.msra.mxu2 %v2263_v24  ;;  %v2255_v39 = vor.u32 %v2538_v34, %v2252_v36  ;;  %v2548_v24 = vld [vmem:[#allocation8 + $0xa4] sm:$0xf] }
 0x19c   :  { %1439 = vmatpush.bf16.msra.mxu0 %v2251_v31  ;;  %v2295_v26 = vor.u32 %v2548_v24, %v2292_v25  ;;  %v2220_v34 = vld [vmem:[#allocation8 + $0x18] sm:$0xf0] }
 0x19d   :  { %v1163_v57 = vsel %vm1162_vm6, %v2599_v20, %v1159_v35  ;;  %v2315_v35 = vor.u32 %v2555_v33, %v2314_v32  ;;  %v2547_v32 = vld [vmem:[#allocation8 + $0x94] sm:$0xf0]  ;;  %v2530_v33 = vld [vmem:[#allocation8 + $0x14] sm:$0xf] }
 0x19e   :  { %v1168_v27 = vsel %vm1165_vm7, %v1167_v37, %v1163_v57  ;;  %v2554_v37 = vld [vmem:[#allocation8 + $0xd4] sm:$0xf]  ;;  %1477 = vmatpush.bf16.msra.mxu3 %v2327_v30  ;;  %v2282_v30 = vld [vmem:[#allocation8 + $0x90] sm:$0xf]  ;;  %v2223_v36 = vor.u32 %v2530_v33, %v2220_v34  ;;  %v2568_v33 = vld [vmem:[#allocation10 + $0x40] sm:$0xff] }
 0x19f   :  { %v1171_v42 = vmul.f32 %v2603_v62, %v1168_v27  ;;  %v2537_v62 = vld [vmem:[#allocation8 + $0x44] sm:$0xf0]  ;;  %v2319_v27 = vor.u32 %v2554_v37, %v2316_v38  ;;  %1452 = vmatpush.bf16.msra.mxu1 %v2315_v35  ;;  %1465 = vmatpush.bf16.msra.mxu2 %v2255_v39  ;;  %v2283_v35 = vor.u32 %v2547_v32, %v2282_v30  ;;  %v2546_v37 = vld [vmem:[#allocation8 + $0x94] sm:$0xf]  ;;  %v2284_v38 = vld [vmem:[#allocation8 + $0x98] sm:$0xf0] }
 0x1a0   :  { %v2210_v39 = vld [vmem:[#allocation8] sm:$0xf]  ;;  %v2570_v30 = vld [vmem:[#allocation10 + $0x50] sm:$0xff]  ;;  %v2569_v32 = vld [vmem:[#allocation10 + $0x48] sm:$0xff] }
 0x1a1   :  { %v1178_v43 = vmul.f32 %v1174_v40, %v1171_v42  ;;  %v2242_v40 = vld [vmem:[#allocation8 + $0x40] sm:$0xf]  ;;  %v117_v34 = vld [vmem:[#allocation11 + $0x8] sm:$0x3] }
 0x1a2   :  { %v2306_v42 = vld [vmem:[#allocation8 + $0xc0] sm:$0xf]  ;;  %1478 = vmatpush.bf16.msra.mxu3 %v2319_v27 }
 0x1a3   :  { %v1179_v44 = vadd.f32 %v1178_v43, %v1177_v53  ;;  %v2553_v53 = vld [vmem:[#allocation8 + $0xc4] sm:$0xf0]  ;;  %v2536_v43 = vld [vmem:[#allocation8 + $0x44] sm:$0xf] }
 0x1a5   :  { %1180 = vadd.xlane.f32.xlu0 %v1179_v44 }
 0x218   :  { %v1181_v45 = vpop.xlane.xlu0 %1180 }
 0x219   :  { %v1185_v46 = vadd.f32 %v2591_v58, %v1181_v45  ;;  %v2243_v58 = vor.u32 %v2537_v62, %v2242_v40  ;;  %v2244_v45 = vld [vmem:[#allocation8 + $0x48] sm:$0xf0]  ;;  %v2529_v40 = vld [vmem:[#allocation8 + $0x4] sm:$0xf0]  ;;  %v2274_v62 = vld [vmem:[#allocation8 + $0x80] sm:$0xf] }
 0x21a   :  { %v2211_v27 = vor.u32 %v2529_v40, %v2210_v39  ;;  %v1434_v39 = vperm.slane %v117_v34, 1 }
 0x21b   :  { %v1187_v47 = vsel %vm1186_vm8, %v1185_v46, -inf  ;;  %1440 = vmatpush.bf16.msra.mxu0 %v2243_v58 }
 0x21c   :  { %v1188_v48 = vrot.slane %v1187_v47, 4 }
 0x21e   :  { %v1189_v49 = vmax.f32 %v1187_v47, %v1188_v48  ;;  %v2308_v47 = vld [vmem:[#allocation8 + $0xc8] sm:$0xf0]  ;;  %v2307_v48 = vor.u32 %v2553_v53, %v2306_v42  ;;  %v2545_v42 = vld [vmem:[#allocation8 + $0x84] sm:$0xf0]  ;;  %v2528_v53 = vld [vmem:[#allocation8 + $0x4] sm:$0xf] }
 0x21f   :  { %1441 = vmatpush.bf16.msra.mxu0 %v2235_v7 }
 0x220   :  { %v1190_v50 = vrot.slane %v1189_v49, 2  ;;  %1453 = vmatpush.bf16.msra.mxu1 %v2307_v48  ;;  %v2567_v48 = vld [vmem:[#allocation10 + $0x38] sm:$0xff] }
 0x222   :  { %v1191_v52 = vmax.f32 %v1189_v49, %v1190_v50  ;;  %v2247_v49 = vor.u32 %v2536_v43, %v2244_v45  ;;  %v2212_v43 = vld [vmem:[#allocation8 + $0x8] sm:$0xf0]  ;;  %v2544_v45 = vld [vmem:[#allocation8 + $0x84] sm:$0xf] }
 0x223   :  { %v2215_v58 = vor.u32 %v2528_v53, %v2212_v43 }
 0x224   :  { %v1192_v54 = vrot.slane %v1191_v52, 1  ;;  %1466 = vmatpush.bf16.msra.mxu2 %v2247_v49  ;;  %1454 = vmatpush.bf16.msra.mxu1 %v2299_v11  ;;  %v2575_v49 = vld [vmem:[#allocation10 + $0x78] sm:$0xff] }
 0x226   :  { %v1193_v55 = vmax.f32 %v1191_v52, %v1192_v54 }
 0x228   :  { %v1194_v56 = vsub.f32 %v1185_v46, %v1193_v55  ;;  %v2552_v46 = vld [vmem:[#allocation8 + $0xc4] sm:$0xf]  ;;  %1455 = vmatpush.bf16.msra.mxu1 %v2291_v22 }
 0x229   :  { %v2311_v50 = vor.u32 %v2552_v46, %v2308_v47  ;;  %v2276_v46 = vld [vmem:[#allocation8 + $0x88] sm:$0xf0] }
 0x22a   :  { %v1195_v59 = vmul.f32 1.442695, %v1194_v56  ;;  %v2279_v47 = vor.u32 %v2544_v45, %v2276_v46 }
 0x22b   :  { %1479 = vmatpush.bf16.msra.mxu3 %v2311_v50  ;;  %v2566_v50 = vld [vmem:[#allocation10 + $0x30] sm:$0xff] }
 0x22c   :  { %2604 = vpow2.f32 %v1195_v59  ;;  %1456 = vmatpush.bf16.msra.mxu1 %v2283_v35  ;;  %v1433_v35 = vperm.slane %v117_v34, 0 }
 0x22f   :  { %1480 = vmatpush.bf16.msra.mxu3 %v2303_v15 }
 0x232   :  { %v2882_v60 = vpop.eup %2604 }
 0x233   :  { %v1197_v61 = vsel %vm1186_vm8, %v2882_v60, 0.0  ;;  %1481 = vmatpush.bf16.msra.mxu3 %v2295_v26 }
 0x234   :  { %v1198_v1 = vrot.slane %v1197_v61, 4 }
 0x236   :  { %v1199_v10 = vadd.f32 %v1198_v1, %v1197_v61 }
 0x238   :  { %v1200_v20 = vrot.slane %v1199_v10, 2 }
 0x23a   :  { %v1201_v29 = vadd.f32 %v1200_v20, %v1199_v10  ;;  %v2236_v10 = vld [vmem:[#allocation8 + $0x38] sm:$0xf0]  ;;  %v2532_v20 = vld [vmem:[#allocation8 + $0x24] sm:$0xf] }
 0x23b   :  { %v2239_v12 = vor.u32 %v2534_v9, %v2236_v10  ;;  %v2231_v23 = vor.u32 %v2532_v20, %v2228_v21  ;;  %v2562_v10 = vld [vmem:[#allocation10 + $0x10] sm:$0xff] }
 0x23c   :  { %v1202_v57 = vrot.slane %v1201_v29, 1 }
 0x23d   :  { %1467 = vmatpush.bf16.msra.mxu2 %v2239_v12 }
 0x23e   :  { %v1203_v44 = vadd.f32 %v1202_v57, %v1201_v29  ;;  %v2531_v29 = vld [vmem:[#allocation8 + $0x14] sm:$0xf0]  ;;  %v2287_v57 = vor.u32 %v2546_v37, %v2284_v38 }
 0x23f   :  { %v2219_v31 = vor.u32 %v2531_v29, %v2218_v28  ;;  %v2571_v28 = vld [vmem:[#allocation10 + $0x58] sm:$0xff]  ;;  %v2561_v29 = vld [vmem:[#allocation10 + $0x8] sm:$0xff] }
 0x240   :  { %2606 = vrcp.f32 %v1203_v44  ;;  %v1215_v55 = vand.u32 2147483648, %v1203_v44  ;;  %v1213_v59 = vand.u32 2147483647, %v1203_v44  ;;  %vm1209_vm10 = vweird.f32 %v1203_v44  ;;  %1482 = vmatpush.bf16.msra.mxu3 %v2287_v57 }
 0x241   :  { %1468 = vmatpush.bf16.msra.mxu2 %v2231_v23 }
 0x242   :  { %v1216_v63 = vor.u32 1.1754944e-38, %v1215_v55  ;;  %vm1214_vm12 = vcmp.eq.f32.partialorder %v1213_v59, 8.507059e+37  ;;  %v2573_v55 = vld [vmem:[#allocation10 + $0x68] sm:$0xff] }
 0x244   :  { %1483 = vmatpush.bf16.msra.mxu3 %v2279_v47 }
 0x245   :  { %1469 = vmatpush.bf16.msra.mxu2 %v2223_v36 }
 0x246   :  { %v2607_v51 = vpop.eup %2606 }
 0x247   :  { %v1205_v52 = vmul.f32 %v2607_v51, %v1203_v44  ;;  %vm1210_vm9 = vweird.f32 %v2607_v51  ;;  %v2275_v44 = vor.u32 %v2545_v42, %v2274_v62 }
 0x248   :  { %vm1211_vm11 = vmor %vm1209_vm10, %vm1210_vm9 }
 0x249   :  { %v1206_v54 = vsub.f32 1.0, %v1205_v52  ;;  %1457 = vmatpush.bf16.msra.mxu1 %v2275_v44  ;;  %1470 = vmatpush.bf16.msra.mxu2 %v2215_v58  ;;  %v1647_v52 = vlaneseq }
 0x24b   :  { %v1207_v56 = vmul.f32 %v2607_v51, %v1206_v54  ;;  %v2565_v54 = vld [vmem:[#allocation10 + $0x28] sm:$0xff]  ;;  %v1650_v59 = vshrl.u32 %v1647_v52, 7  ;;  %vm2889_vm14 = vcmp.lt.s32.totalorder %v1647_v52, 128  ;;  %vm1667_vm0 = vcmp.lt.s32.totalorder %v1647_v52, 256 }
 0x24d   :  { %v1208_v61 = vadd.f32 %v2607_v51, %v1207_v56  ;;  %1634 = vmatpush.bf16.msrb.mxu1 %v2575_v49  ;;  %v1648_v56 = vand.u32 127, %v1647_v52 }
 0x24f   :  { %v1212_v0 = vsel %vm1211_vm11, %v2607_v51, %v1208_v61  ;;  %v2574_v51 = vld [vmem:[#allocation10 + $0x70] sm:$0xff]  ;;  %v2564_v61 = vld [vmem:[#allocation10 + $0x20] sm:$0xff]  ;;  %vm1651_vm13 = vcmp.eq.s32.totalorder %v1648_v56, %v1650_v59 }
 0x250   :  { %v1217_v1 = vsel %vm1214_vm12, %v1216_v63, %v1212_v0  ;;  %v2572_v63 = vld [vmem:[#allocation10 + $0x60] sm:$0xff] }
 0x251   :  { %v1218_v3 = vmul.f32 %v2882_v60, %v1217_v1  ;;  %v2227_v60 = vor.u32 %v2533_v17, %v2226_v16  ;;  %1635 = vmatpush.bf16.msrb.mxu1 %v2574_v51  ;;  %v2563_v1 = vld [vmem:[#allocation10 + $0x18] sm:$0xff] }
 0x253   :  { %1221 = vperm.xlu0 %2590, %v1218_v3   ;;  %1442 = vmatpush.bf16.msra.mxu0 %v2227_v60 }
 0x255   :  { %1636 = vmatpush.bf16.msrb.mxu1 %v2573_v55 }
 0x257   :  { %1443 = vmatpush.bf16.msra.mxu0 %v2219_v31  ;;  %v2560_v31 = vld [vmem:[#allocation10] sm:$0xff] }
 0x259   :  { %1637 = vmatpush.bf16.msrb.mxu1 %v2572_v63 }
 0x25b   :  { %1444 = vmatpush.bf16.msra.mxu0 %v2211_v27 }
 0x25d   :  { %1638 = vmatpush.bf16.msrb.mxu1 %v2571_v28 }
 0x25f   :  { %1621 = vmatpush.bf16.msrb.mxu0 %v2567_v48 }
 0x261   :  { %1639 = vmatpush.bf16.msrb.mxu1 %v2570_v30 }
 0x263   :  { %1622 = vmatpush.bf16.msrb.mxu0 %v2566_v50  ;;  %v118_v50 = vld [vmem:[#allocation11 + $0xa] sm:$0x1] }
 0x265   :  { %1640 = vmatpush.bf16.msrb.mxu1 %v2569_v32 }
 0x267   :  { %1623 = vmatpush.bf16.msrb.mxu0 %v2565_v54 }
 0x269   :  { %1641 = vmatpush.bf16.msrb.mxu1 %v2568_v33 }
 0x26b   :  { %1624 = vmatpush.bf16.msrb.mxu0 %v2564_v61 }
 0x26f   :  { %1625 = vmatpush.bf16.msrb.mxu0 %v2563_v1 }
 0x273   :  { %1626 = vmatpush.bf16.msrb.mxu0 %v2562_v10 }
 0x277   :  { %1627 = vmatpush.bf16.msrb.mxu0 %v2561_v29 }
 0x27b   :  { %1628 = vmatpush.bf16.msrb.mxu0 %v2560_v31 }
 0x2c5   :  { %v1222_v0 = vpop.permute.xlu0 %1221 }
 0x2c6   :  { %v1224_v3 = vmul.f32 %v1222_v0, %v2872_v2  ;;  %v1225_v4 = vmul.f32 %v1222_v0, %v2877_v41  ;;  %v1652_v5 = vsel %vm1651_vm13, %v1222_v0, 0.0 }
 0x2c7   :  { %v1653_v6 = vrot.slane %v1652_v5, 4 }
 0x2c8   :  { %v1226_v7 = vrot.slane %v1224_v3, 4  ;;  %v1232_v8 = vrot.slane %v1225_v4, 4 }
 0x2c9   :  { %v1654_v9 = vadd.f32 %v1653_v6, %v1652_v5 }
 0x2ca   :  { %v1227_v11 = vadd.f32 %v1226_v7, %v1224_v3  ;;  %v1233_v12 = vadd.f32 %v1232_v8, %v1225_v4 }
 0x2cb   :  { %v1655_v13 = vrot.slane %v1654_v9, 2 }
 0x2cc   :  { %v1228_v14 = vrot.slane %v1227_v11, 2  ;;  %v1234_v15 = vrot.slane %v1233_v12, 2 }
 0x2cd   :  { %v1656_v16 = vadd.f32 %v1655_v13, %v1654_v9 }
 0x2ce   :  { %v1229_v17 = vadd.f32 %v1228_v14, %v1227_v11  ;;  %v1235_v18 = vadd.f32 %v1234_v15, %v1233_v12 }
 0x2cf   :  { %v1657_v60 = vrot.slane %v1656_v16, 1 }
 0x2d0   :  { %v1230_v2 = vrot.slane %v1229_v17, 1  ;;  %v1236_v19 = vrot.slane %v1235_v18, 1 }
 0x2d1   :  { %v1658_v20 = vadd.f32 %v1657_v60, %v1656_v16 }
 0x2d2   :  { %v1231_v21 = vadd.f32 %v1230_v2, %v1229_v17  ;;  %v1237_v22 = vadd.f32 %v1236_v19, %v1235_v18 }
 0x2d3   :  { %1673 = vst.msk [vmem:[#allocation13 + $0x3] sm:$0x1] %vm2889_vm14, %v1658_v20 }
 0x2d4   :  { %v1661_v23 = vrot.slane %v1237_v22, 7  ;;  %v1238_v24 = vpack.c.bf16 %v1231_v21, %v1231_v21  ;;  %v1239_v25 = vpack.c.bf16 %v1237_v22, %v1237_v22 }
 0x2d6   :  { %1445 = vmatmul.bf16.vlgmr.msra.gmra.mxu0 %v1238_v24  ;;  %1458 = vmatmul.bf16.vlgmr.msra.gmra.mxu1 %v1239_v25  ;;  %v1663_v26 = vsel %vm1662_vm15, %v1231_v21, %v1661_v23 }
 0x2d7   :  { %1471 = vmatmul.bf16.vlgmr.msra.gmra.mxu2 %v1238_v24  ;;  %1484 = vmatmul.bf16.vlgmr.msra.gmra.mxu3 %v1239_v25  ;;  %1669 = vst.msk [vmem:[#allocation13] sm:$0x3] %vm1667_vm0, %v1663_v26 }
 0x353   :  { %v1446_v36 = vpop.f32.mrf.mxu0  ;;  %v1459_v37 = vpop.f32.mrf.mxu1 }
 0x354   :  { %v1447_v38 = vadd.f32 %v1446_v36, %v1433_v35 }
 0x356   :  { %v1460_v57 = vadd.f32 %v1459_v37, %v1447_v38 }
 0x358   :  { %v1489_v40 = vmax.f32 %v1460_v57, 0.0 }
 0x35a   :  { %v1491_v62 = vpack.c.bf16 %v1489_v40, %v1489_v40  ;;  %v1472_v27 = vpop.f32.mrf.mxu2  ;;  %v1485_v42 = vpop.f32.mrf.mxu3 }
 0x35b   :  { %v1473_v53 = vadd.f32 %v1472_v27, %v1434_v39  ;;  %v1448_v43 = vpop.f32.mrf.mxu0  ;;  %v1461_v44 = vpop.f32.mrf.mxu1 }
 0x35c   :  { %1629 = vmatmul.bf16.vlgmr.msrb.gmra.mxu0 %v1491_v62 }
 0x35d   :  { %v1486_v58 = vadd.f32 %v1485_v42, %v1473_v53 }
 0x35f   :  { %v1490_v45 = vmax.f32 %v1486_v58, 0.0 }
 0x361   :  { %v1492_v46 = vpack.c.bf16 %v1490_v45, %v1490_v45 }
 0x362   :  { %v1474_v47 = vpop.f32.mrf.mxu2  ;;  %v1487_v48 = vpop.f32.mrf.mxu3 }
 0x363   :  { %1642 = vmatmul.bf16.vlgmr.msrb.gmra.mxu1 %v1492_v46 }
 0x3d9   :  { %v1630_v49 = vpop.f32.mrf.mxu0 }
 0x3da   :  { %v1631_v51 = vadd.f32 %v1630_v49, %v118_v50 }
 0x3e0   :  { %v1643_v52 = vpop.f32.mrf.mxu1 }
 0x3e1   :  { %v1644_v54 = vadd.f32 %v1643_v52, %v1631_v51  ;;  %v1632_v55 = vpop.f32.mrf.mxu0 }
 0x3e3   :  { %1672 = vst.msk [vmem:[#allocation13 + $0x2] sm:$0x1] %vm2889_vm14, %v1644_v54 }
 0x3e4   :  { %1684 = dma.vmem_to_hbm [thread:$0]  %s1680_s5, 64, %s1682_s7, [#allocation4]  }
 0x3e8   :  { %v1645_v56 = vpop.f32.mrf.mxu1 }
 0x3e9   :  { %2784 = dma.done.wait [#allocation4], 64  }
 0x3ea   :  { %2785 = vsyncadd [#allocation4], 4294967232 }
 0x3eb   :  { %1689 = vsyncpa [#allocation3], 1 }
 0x3ec   :  { %1690 = vsyncpa [#allocation6], 1 }
 0x3ed   :  { %1691 = vsyncpa [#allocation9], 1 }
 0x3ee   :  { %1692 = vsyncpa [#allocation12], 1 }
 0x3ef   :  { %1693 = vsyncpa [#allocation4], 1 }

</bundles_post_ra>
